<compile_context>
chip_gen: v7x
topology: tpu7x:2x2x1
jax: 0.10.0
libtpu: 0.0.40
codegen_flags: <defaults>
</compile_context>

<pallas_src>
import jax
import jax.numpy as jnp
from jax.experimental import pallas as pl
from jax.experimental.pallas import tpu as pltpu


def bigru_classifier_kernel(x_ref, z_ref, wih_ref, gbias_ref,
                            whh_fr_ref, whh_fz_ref, whh_fn_ref,
                            whh_br_ref, whh_bz_ref, whh_bn_ref,
                            bhhn_f_ref, bhhn_b_ref,
                            wc_hf_ref, wc_hb_ref, wc_z_ref, bc_ref,
                            out_ref):
    TB, _ = x_ref.shape
    B = z_ref.shape[0]
    T = TB // B
    H = whh_fr_ref.shape[0]

    # ---- hoisted input projection for BOTH directions: one well-shaped matmul
    gi = jnp.dot(x_ref[...], wih_ref[...],
                 preferred_element_type=jnp.float32) + gbias_ref[...]
    # split per direction / per gate ONCE (off the serial critical path)
    gi_fr = gi[:, 0 * H:1 * H]
    gi_fz = gi[:, 1 * H:2 * H]
    gi_fn = gi[:, 2 * H:3 * H]
    gi_br = gi[:, 3 * H:4 * H]
    gi_bz = gi[:, 4 * H:5 * H]
    gi_bn = gi[:, 5 * H:6 * H]

    whh_fr = whh_fr_ref[...]; whh_fz = whh_fz_ref[...]; whh_fn = whh_fn_ref[...]
    whh_br = whh_br_ref[...]; whh_bz = whh_bz_ref[...]; whh_bn = whh_bn_ref[...]
    bhhn_f = bhhn_f_ref[...]
    bhhn_b = bhhn_b_ref[...]

    hf = jnp.zeros((B, H), jnp.float32)
    hb = jnp.zeros((B, H), jnp.float32)

    # ---- fused, fully-unrolled recurrence (T static & small):
    #      fwd consumes time t, bwd consumes time T-1-t; the two hidden-state
    #      chains are independent, so their per-step work interleaves freely.
    for t in range(T):
        lo_f = t * B
        lo_b = (T - 1 - t) * B
        # forward direction (per-gate (B,H)x(H,H) matmuls -> no gate slicing)
        r_f = jax.nn.sigmoid(
            gi_fr[lo_f:lo_f + B, :]
            + jnp.dot(hf, whh_fr, preferred_element_type=jnp.float32))
        z_f = jax.nn.sigmoid(
            gi_fz[lo_f:lo_f + B, :]
            + jnp.dot(hf, whh_fz, preferred_element_type=jnp.float32))
        n_f = jnp.tanh(
            gi_fn[lo_f:lo_f + B, :]
            + r_f * (jnp.dot(hf, whh_fn, preferred_element_type=jnp.float32)
                     + bhhn_f))
        # backward direction
        r_b = jax.nn.sigmoid(
            gi_br[lo_b:lo_b + B, :]
            + jnp.dot(hb, whh_br, preferred_element_type=jnp.float32))
        z_b = jax.nn.sigmoid(
            gi_bz[lo_b:lo_b + B, :]
            + jnp.dot(hb, whh_bz, preferred_element_type=jnp.float32))
        n_b = jnp.tanh(
            gi_bn[lo_b:lo_b + B, :]
            + r_b * (jnp.dot(hb, whh_bn, preferred_element_type=jnp.float32)
                     + bhhn_b))
        hf = (1.0 - z_f) * n_f + z_f * hf
        hb = (1.0 - z_b) * n_b + z_b * hb

    # ---- classifier: [hf | hb | z] @ Wc + bc as VPU mul + lane-axis reduce
    #      (avoids three N=1 MXU matmuls at the tail)
    out = (jnp.sum(hf * wc_hf_ref[...], axis=-1, keepdims=True)
           + jnp.sum(hb * wc_hb_ref[...], axis=-1, keepdims=True)
           + jnp.sum(z_ref[...] * wc_z_ref[...], axis=-1, keepdims=True)
           + bc_ref[...])
    out_ref[...] = out


def bigru_forward(x_ids, z, params):
    B, T = x_ids.shape
    E = params["embedding"].shape[1]
    H = params["whh_f"].shape[1]          # whh_*: (3H, H)

    # Embedding gather directly in time-major order, flattened to (T*B, E).
    x_flat = params["embedding"][x_ids.T].reshape(T * B, E)

    # Combined input-projection weight (E, 6H): [f_r | f_z | f_n | b_r | b_z | b_n]
    wih_all = jnp.concatenate([params["wih_f"].T, params["wih_b"].T], axis=1)

    def folded_bias(bih, bhh):
        # r,z gates: bih+bhh folds into the hoisted projection;
        # n gate: only bih (bhh_n must stay inside the r* term per PyTorch).
        return jnp.concatenate([bih[0:H] + bhh[0:H],
                                bih[H:2 * H] + bhh[H:2 * H],
                                bih[2 * H:3 * H]])

    gbias = jnp.concatenate([folded_bias(params["bih_f"], params["bhh_f"]),
                             folded_bias(params["bih_b"], params["bhh_b"])])[None, :]

    whh_fT = params["whh_f"].T            # (H, 3H)
    whh_bT = params["whh_b"].T
    whh_fr, whh_fz, whh_fn = (whh_fT[:, 0:H], whh_fT[:, H:2 * H], whh_fT[:, 2 * H:3 * H])
    whh_br, whh_bz, whh_bn = (whh_bT[:, 0:H], whh_bT[:, H:2 * H], whh_bT[:, 2 * H:3 * H])

    bhhn_f = params["bhh_f"][2 * H:3 * H][None, :]
    bhhn_b = params["bhh_b"][2 * H:3 * H][None, :]

    wc = params["wc"]                     # (1, 2H + Z)
    wc_hf, wc_hb, wc_z = wc[:, 0:H], wc[:, H:2 * H], wc[:, 2 * H:]
    bc = params["bc"][None, :]            # (1, 1)

    args = (x_flat, z, wih_all, gbias,
            whh_fr, whh_fz, whh_fn, whh_br, whh_bz, whh_bn,
            bhhn_f, bhhn_b, wc_hf, wc_hb, wc_z, bc)

    vmem = pl.BlockSpec(memory_space=pltpu.MemorySpace.VMEM)
    # TODO(synk): for production sequence lengths (T*B*E*4 approaching the
    # 32/64 MiB VMEM budget) block the sequence over T with a grid + BlockSpec
    # (h carried in VMEM scratch across grid steps) instead of whole-sequence
    # residency; on v7x the two directions could also be split across the 2 TCs.
    return pl.pallas_call(
        bigru_classifier_kernel,
        out_shape=jax.ShapeDtypeStruct((B, 1), jnp.float32),
        in_specs=[vmem] * len(args),
        out_specs=vmem,
    )(*args)


# ---------------- pure-JAX reference (PyTorch GRU semantics) ----------------
def _gru_dir_ref(x_emb, wih, whh, bih, bhh, H, reverse):
    B, T, _ = x_emb.shape
    h = jnp.zeros((B, H), jnp.float32)
    ts = range(T - 1, -1, -1) if reverse else range(T)
    for t in ts:
        xt = x_emb[:, t, :]
        gi = xt @ wih.T + bih
        gh = h @ whh.T + bhh
        r = jax.nn.sigmoid(gi[:, :H] + gh[:, :H])
        zg = jax.nn.sigmoid(gi[:, H:2 * H] + gh[:, H:2 * H])
        n = jnp.tanh(gi[:, 2 * H:] + r * gh[:, 2 * H:])
        h = (1.0 - zg) * n + zg * h
    return h


def forward_ref(x_ids, z, params, H):
    x_emb = params["embedding"][x_ids]
    hf = _gru_dir_ref(x_emb, params["wih_f"], params["whh_f"],
                      params["bih_f"], params["bhh_f"], H, reverse=False)
    hb = _gru_dir_ref(x_emb, params["wih_b"], params["whh_b"],
                      params["bih_b"], params["bhh_b"], H, reverse=True)
    feat = jnp.concatenate([hf, hb, z], axis=1)
    return feat @ params["wc"].T + params["bc"][None, :]


if __name__ == "__main__":
    V, E, H, Z = 2000, 128, 32, 1       # vocab, embed_dim, gru_out, z_dim
    B, T = 2, 8                         # small batch / sequence length

    key = jax.random.PRNGKey(0)
    keys = jax.random.split(key, 14)
    kinit = 1.0 / jnp.sqrt(H)

    def u(kk, shape):
        return jax.random.uniform(kk, shape, jnp.float32, -kinit, kinit)

    params = {
        "embedding": jax.random.normal(keys[0], (V, E), jnp.float32),
        "wih_f": u(keys[1], (3 * H, E)),
        "whh_f": u(keys[2], (3 * H, H)),
        "bih_f": u(keys[3], (3 * H,)),
        "bhh_f": u(keys[4], (3 * H,)),
        "wih_b": u(keys[5], (3 * H, E)),
        "whh_b": u(keys[6], (3 * H, H)),
        "bih_b": u(keys[7], (3 * H,)),
        "bhh_b": u(keys[8], (3 * H,)),
        "wc": jax.random.uniform(keys[9], (1, 2 * H + Z), jnp.float32, -0.1, 0.1),
        "bc": jax.random.uniform(keys[10], (1,), jnp.float32, -0.1, 0.1),
    }

    x_ids = jax.random.randint(keys[11], (B, T), 0, V, jnp.int32)
    z = jax.random.normal(keys[12], (B, Z), jnp.float32)

    out = jax.block_until_ready(bigru_forward(x_ids, z, params))
    ref = forward_ref(x_ids, z, params, H)

    assert out.shape == (B, 1), out.shape
    assert jnp.allclose(out, ref, atol=1e-4, rtol=1e-4), (out, ref)
    print("KERNEL_OK")
</pallas_src>

<mosaic_0001>
module attributes {stable_mosaic.version = 11 : i64} {
  func.func @bigru_classifier_kernel(%arg0: memref<16x128xf32, #tpu.memory_space<vmem>>, %arg1: memref<2x1xf32, #tpu.memory_space<vmem>>, %arg2: memref<128x192xf32, #tpu.memory_space<vmem>>, %arg3: memref<1x192xf32, #tpu.memory_space<vmem>>, %arg4: memref<32x32xf32, #tpu.memory_space<vmem>>, %arg5: memref<32x32xf32, #tpu.memory_space<vmem>>, %arg6: memref<32x32xf32, #tpu.memory_space<vmem>>, %arg7: memref<32x32xf32, #tpu.memory_space<vmem>>, %arg8: memref<32x32xf32, #tpu.memory_space<vmem>>, %arg9: memref<32x32xf32, #tpu.memory_space<vmem>>, %arg10: memref<1x32xf32, #tpu.memory_space<vmem>>, %arg11: memref<1x32xf32, #tpu.memory_space<vmem>>, %arg12: memref<1x32xf32, #tpu.memory_space<vmem>>, %arg13: memref<1x32xf32, #tpu.memory_space<vmem>>, %arg14: memref<1x1xf32, #tpu.memory_space<vmem>>, %arg15: memref<1x1xf32, #tpu.memory_space<vmem>>, %arg16: memref<2x1xf32, #tpu.memory_space<vmem>>) attributes {dimension_semantics = [], scalar_prefetch = 0 : i64, scratch_operands = 0 : i64, tpu.core_type = #tpu.core_type<tc>} {
    %c0 = arith.constant 0 : index
    %c0_0 = arith.constant 0 : index
    %0 = vector.load %arg0[%c0, %c0_0] : memref<16x128xf32, #tpu.memory_space<vmem>>, vector<16x128xf32>
    %c0_1 = arith.constant 0 : index
    %c0_2 = arith.constant 0 : index
    %1 = vector.load %arg2[%c0_1, %c0_2] : memref<128x192xf32, #tpu.memory_space<vmem>>, vector<128x192xf32>
    %cst = arith.constant dense<0.000000e+00> : vector<16x192xf32>
    %2 = tpu.matmul %0, %1, %cst {dimension_numbers = #tpu.dot_dimension_numbers<[1], [0], [0], [1], [0, 0, 1, 1], [], []>} : vector<16x128xf32>, vector<128x192xf32>, vector<16x192xf32> -> vector<16x192xf32>
    %c0_3 = arith.constant 0 : index
    %c0_4 = arith.constant 0 : index
    %3 = vector.load %arg3[%c0_3, %c0_4] : memref<1x192xf32, #tpu.memory_space<vmem>>, vector<1x192xf32>
    %4 = vector.broadcast %3 : vector<1x192xf32> to vector<16x192xf32>
    %5 = arith.addf %2, %4 : vector<16x192xf32>
    %6 = vector.extract_strided_slice %5 {offsets = [0, 0], sizes = [16, 32], strides = [1, 1]} : vector<16x192xf32> to vector<16x32xf32>
    %7 = vector.extract_strided_slice %5 {offsets = [0, 32], sizes = [16, 32], strides = [1, 1]} : vector<16x192xf32> to vector<16x32xf32>
    %8 = vector.extract_strided_slice %5 {offsets = [0, 64], sizes = [16, 32], strides = [1, 1]} : vector<16x192xf32> to vector<16x32xf32>
    %9 = vector.extract_strided_slice %5 {offsets = [0, 96], sizes = [16, 32], strides = [1, 1]} : vector<16x192xf32> to vector<16x32xf32>
    %10 = vector.extract_strided_slice %5 {offsets = [0, 128], sizes = [16, 32], strides = [1, 1]} : vector<16x192xf32> to vector<16x32xf32>
    %11 = vector.extract_strided_slice %5 {offsets = [0, 160], sizes = [16, 32], strides = [1, 1]} : vector<16x192xf32> to vector<16x32xf32>
    %c0_5 = arith.constant 0 : index
    %c0_6 = arith.constant 0 : index
    %12 = vector.load %arg4[%c0_5, %c0_6] : memref<32x32xf32, #tpu.memory_space<vmem>>, vector<32x32xf32>
    %c0_7 = arith.constant 0 : index
    %c0_8 = arith.constant 0 : index
    %13 = vector.load %arg5[%c0_7, %c0_8] : memref<32x32xf32, #tpu.memory_space<vmem>>, vector<32x32xf32>
    %c0_9 = arith.constant 0 : index
    %c0_10 = arith.constant 0 : index
    %14 = vector.load %arg6[%c0_9, %c0_10] : memref<32x32xf32, #tpu.memory_space<vmem>>, vector<32x32xf32>
    %c0_11 = arith.constant 0 : index
    %c0_12 = arith.constant 0 : index
    %15 = vector.load %arg7[%c0_11, %c0_12] : memref<32x32xf32, #tpu.memory_space<vmem>>, vector<32x32xf32>
    %c0_13 = arith.constant 0 : index
    %c0_14 = arith.constant 0 : index
    %16 = vector.load %arg8[%c0_13, %c0_14] : memref<32x32xf32, #tpu.memory_space<vmem>>, vector<32x32xf32>
    %c0_15 = arith.constant 0 : index
    %c0_16 = arith.constant 0 : index
    %17 = vector.load %arg9[%c0_15, %c0_16] : memref<32x32xf32, #tpu.memory_space<vmem>>, vector<32x32xf32>
    %c0_17 = arith.constant 0 : index
    %c0_18 = arith.constant 0 : index
    %18 = vector.load %arg10[%c0_17, %c0_18] : memref<1x32xf32, #tpu.memory_space<vmem>>, vector<1x32xf32>
    %c0_19 = arith.constant 0 : index
    %c0_20 = arith.constant 0 : index
    %19 = vector.load %arg11[%c0_19, %c0_20] : memref<1x32xf32, #tpu.memory_space<vmem>>, vector<1x32xf32>
    %cst_21 = arith.constant 0.000000e+00 : f32
    %20 = vector.broadcast %cst_21 : f32 to vector<2x32xf32>
    %cst_22 = arith.constant 0.000000e+00 : f32
    %21 = vector.broadcast %cst_22 : f32 to vector<2x32xf32>
    %22 = vector.extract_strided_slice %6 {offsets = [0, 0], sizes = [2, 32], strides = [1, 1]} : vector<16x32xf32> to vector<2x32xf32>
    %cst_23 = arith.constant dense<0.000000e+00> : vector<2x32xf32>
    %23 = tpu.matmul %20, %12, %cst_23 {dimension_numbers = #tpu.dot_dimension_numbers<[1], [0], [0], [1], [0, 0, 1, 1], [], []>} : vector<2x32xf32>, vector<32x32xf32>, vector<2x32xf32> -> vector<2x32xf32>
    %24 = arith.addf %22, %23 : vector<2x32xf32>
    %25 = arith.negf %24 : vector<2x32xf32>
    %26 = math.exp %25 : vector<2x32xf32>
    %cst_24 = arith.constant 1.000000e+00 : f32
    %27 = vector.broadcast %cst_24 : f32 to vector<2x32xf32>
    %28 = arith.addf %27, %26 : vector<2x32xf32>
    %29 = arith.divf %27, %28 : vector<2x32xf32>
    %30 = vector.extract_strided_slice %7 {offsets = [0, 0], sizes = [2, 32], strides = [1, 1]} : vector<16x32xf32> to vector<2x32xf32>
    %cst_25 = arith.constant dense<0.000000e+00> : vector<2x32xf32>
    %31 = tpu.matmul %20, %13, %cst_25 {dimension_numbers = #tpu.dot_dimension_numbers<[1], [0], [0], [1], [0, 0, 1, 1], [], []>} : vector<2x32xf32>, vector<32x32xf32>, vector<2x32xf32> -> vector<2x32xf32>
    %32 = arith.addf %30, %31 : vector<2x32xf32>
    %33 = arith.negf %32 : vector<2x32xf32>
    %34 = math.exp %33 : vector<2x32xf32>
    %cst_26 = arith.constant 1.000000e+00 : f32
    %35 = vector.broadcast %cst_26 : f32 to vector<2x32xf32>
    %36 = arith.addf %35, %34 : vector<2x32xf32>
    %37 = arith.divf %35, %36 : vector<2x32xf32>
    %38 = vector.extract_strided_slice %8 {offsets = [0, 0], sizes = [2, 32], strides = [1, 1]} : vector<16x32xf32> to vector<2x32xf32>
    %cst_27 = arith.constant dense<0.000000e+00> : vector<2x32xf32>
    %39 = tpu.matmul %20, %14, %cst_27 {dimension_numbers = #tpu.dot_dimension_numbers<[1], [0], [0], [1], [0, 0, 1, 1], [], []>} : vector<2x32xf32>, vector<32x32xf32>, vector<2x32xf32> -> vector<2x32xf32>
    %40 = vector.broadcast %18 : vector<1x32xf32> to vector<2x32xf32>
    %41 = arith.addf %39, %40 : vector<2x32xf32>
    %42 = arith.mulf %29, %41 : vector<2x32xf32>
    %43 = arith.addf %38, %42 : vector<2x32xf32>
    %44 = math.tanh %43 : vector<2x32xf32>
    %45 = vector.extract_strided_slice %9 {offsets = [14, 0], sizes = [2, 32], strides = [1, 1]} : vector<16x32xf32> to vector<2x32xf32>
    %cst_28 = arith.constant dense<0.000000e+00> : vector<2x32xf32>
    %46 = tpu.matmul %21, %15, %cst_28 {dimension_numbers = #tpu.dot_dimension_numbers<[1], [0], [0], [1], [0, 0, 1, 1], [], []>} : vector<2x32xf32>, vector<32x32xf32>, vector<2x32xf32> -> vector<2x32xf32>
    %47 = arith.addf %45, %46 : vector<2x32xf32>
    %48 = arith.negf %47 : vector<2x32xf32>
    %49 = math.exp %48 : vector<2x32xf32>
    %cst_29 = arith.constant 1.000000e+00 : f32
    %50 = vector.broadcast %cst_29 : f32 to vector<2x32xf32>
    %51 = arith.addf %50, %49 : vector<2x32xf32>
    %52 = arith.divf %50, %51 : vector<2x32xf32>
    %53 = vector.extract_strided_slice %10 {offsets = [14, 0], sizes = [2, 32], strides = [1, 1]} : vector<16x32xf32> to vector<2x32xf32>
    %cst_30 = arith.constant dense<0.000000e+00> : vector<2x32xf32>
    %54 = tpu.matmul %21, %16, %cst_30 {dimension_numbers = #tpu.dot_dimension_numbers<[1], [0], [0], [1], [0, 0, 1, 1], [], []>} : vector<2x32xf32>, vector<32x32xf32>, vector<2x32xf32> -> vector<2x32xf32>
    %55 = arith.addf %53, %54 : vector<2x32xf32>
    %56 = arith.negf %55 : vector<2x32xf32>
    %57 = math.exp %56 : vector<2x32xf32>
    %cst_31 = arith.constant 1.000000e+00 : f32
    %58 = vector.broadcast %cst_31 : f32 to vector<2x32xf32>
    %59 = arith.addf %58, %57 : vector<2x32xf32>
    %60 = arith.divf %58, %59 : vector<2x32xf32>
    %61 = vector.extract_strided_slice %11 {offsets = [14, 0], sizes = [2, 32], strides = [1, 1]} : vector<16x32xf32> to vector<2x32xf32>
    %cst_32 = arith.constant dense<0.000000e+00> : vector<2x32xf32>
    %62 = tpu.matmul %21, %17, %cst_32 {dimension_numbers = #tpu.dot_dimension_numbers<[1], [0], [0], [1], [0, 0, 1, 1], [], []>} : vector<2x32xf32>, vector<32x32xf32>, vector<2x32xf32> -> vector<2x32xf32>
    %63 = vector.broadcast %19 : vector<1x32xf32> to vector<2x32xf32>
    %64 = arith.addf %62, %63 : vector<2x32xf32>
    %65 = arith.mulf %52, %64 : vector<2x32xf32>
    %66 = arith.addf %61, %65 : vector<2x32xf32>
    %67 = math.tanh %66 : vector<2x32xf32>
    %cst_33 = arith.constant 1.000000e+00 : f32
    %68 = vector.broadcast %cst_33 : f32 to vector<2x32xf32>
    %69 = arith.subf %68, %37 : vector<2x32xf32>
    %70 = arith.mulf %69, %44 : vector<2x32xf32>
    %71 = arith.mulf %37, %20 : vector<2x32xf32>
    %72 = arith.addf %70, %71 : vector<2x32xf32>
    %cst_34 = arith.constant 1.000000e+00 : f32
    %73 = vector.broadcast %cst_34 : f32 to vector<2x32xf32>
    %74 = arith.subf %73, %60 : vector<2x32xf32>
    %75 = arith.mulf %74, %67 : vector<2x32xf32>
    %76 = arith.mulf %60, %21 : vector<2x32xf32>
    %77 = arith.addf %75, %76 : vector<2x32xf32>
    %78 = vector.extract_strided_slice %6 {offsets = [2, 0], sizes = [2, 32], strides = [1, 1]} : vector<16x32xf32> to vector<2x32xf32>
    %cst_35 = arith.constant dense<0.000000e+00> : vector<2x32xf32>
    %79 = tpu.matmul %72, %12, %cst_35 {dimension_numbers = #tpu.dot_dimension_numbers<[1], [0], [0], [1], [0, 0, 1, 1], [], []>} : vector<2x32xf32>, vector<32x32xf32>, vector<2x32xf32> -> vector<2x32xf32>
    %80 = arith.addf %78, %79 : vector<2x32xf32>
    %81 = arith.negf %80 : vector<2x32xf32>
    %82 = math.exp %81 : vector<2x32xf32>
    %cst_36 = arith.constant 1.000000e+00 : f32
    %83 = vector.broadcast %cst_36 : f32 to vector<2x32xf32>
    %84 = arith.addf %83, %82 : vector<2x32xf32>
    %85 = arith.divf %83, %84 : vector<2x32xf32>
    %86 = vector.extract_strided_slice %7 {offsets = [2, 0], sizes = [2, 32], strides = [1, 1]} : vector<16x32xf32> to vector<2x32xf32>
    %cst_37 = arith.constant dense<0.000000e+00> : vector<2x32xf32>
    %87 = tpu.matmul %72, %13, %cst_37 {dimension_numbers = #tpu.dot_dimension_numbers<[1], [0], [0], [1], [0, 0, 1, 1], [], []>} : vector<2x32xf32>, vector<32x32xf32>, vector<2x32xf32> -> vector<2x32xf32>
    %88 = arith.addf %86, %87 : vector<2x32xf32>
    %89 = arith.negf %88 : vector<2x32xf32>
    %90 = math.exp %89 : vector<2x32xf32>
    %cst_38 = arith.constant 1.000000e+00 : f32
    %91 = vector.broadcast %cst_38 : f32 to vector<2x32xf32>
    %92 = arith.addf %91, %90 : vector<2x32xf32>
    %93 = arith.divf %91, %92 : vector<2x32xf32>
    %94 = vector.extract_strided_slice %8 {offsets = [2, 0], sizes = [2, 32], strides = [1, 1]} : vector<16x32xf32> to vector<2x32xf32>
    %cst_39 = arith.constant dense<0.000000e+00> : vector<2x32xf32>
    %95 = tpu.matmul %72, %14, %cst_39 {dimension_numbers = #tpu.dot_dimension_numbers<[1], [0], [0], [1], [0, 0, 1, 1], [], []>} : vector<2x32xf32>, vector<32x32xf32>, vector<2x32xf32> -> vector<2x32xf32>
    %96 = vector.broadcast %18 : vector<1x32xf32> to vector<2x32xf32>
    %97 = arith.addf %95, %96 : vector<2x32xf32>
    %98 = arith.mulf %85, %97 : vector<2x32xf32>
    %99 = arith.addf %94, %98 : vector<2x32xf32>
    %100 = math.tanh %99 : vector<2x32xf32>
    %101 = vector.extract_strided_slice %9 {offsets = [12, 0], sizes = [2, 32], strides = [1, 1]} : vector<16x32xf32> to vector<2x32xf32>
    %cst_40 = arith.constant dense<0.000000e+00> : vector<2x32xf32>
    %102 = tpu.matmul %77, %15, %cst_40 {dimension_numbers = #tpu.dot_dimension_numbers<[1], [0], [0], [1], [0, 0, 1, 1], [], []>} : vector<2x32xf32>, vector<32x32xf32>, vector<2x32xf32> -> vector<2x32xf32>
    %103 = arith.addf %101, %102 : vector<2x32xf32>
    %104 = arith.negf %103 : vector<2x32xf32>
    %105 = math.exp %104 : vector<2x32xf32>
    %cst_41 = arith.constant 1.000000e+00 : f32
    %106 = vector.broadcast %cst_41 : f32 to vector<2x32xf32>
    %107 = arith.addf %106, %105 : vector<2x32xf32>
    %108 = arith.divf %106, %107 : vector<2x32xf32>
    %109 = vector.extract_strided_slice %10 {offsets = [12, 0], sizes = [2, 32], strides = [1, 1]} : vector<16x32xf32> to vector<2x32xf32>
    %cst_42 = arith.constant dense<0.000000e+00> : vector<2x32xf32>
    %110 = tpu.matmul %77, %16, %cst_42 {dimension_numbers = #tpu.dot_dimension_numbers<[1], [0], [0], [1], [0, 0, 1, 1], [], []>} : vector<2x32xf32>, vector<32x32xf32>, vector<2x32xf32> -> vector<2x32xf32>
    %111 = arith.addf %109, %110 : vector<2x32xf32>
    %112 = arith.negf %111 : vector<2x32xf32>
    %113 = math.exp %112 : vector<2x32xf32>
    %cst_43 = arith.constant 1.000000e+00 : f32
    %114 = vector.broadcast %cst_43 : f32 to vector<2x32xf32>
    %115 = arith.addf %114, %113 : vector<2x32xf32>
    %116 = arith.divf %114, %115 : vector<2x32xf32>
    %117 = vector.extract_strided_slice %11 {offsets = [12, 0], sizes = [2, 32], strides = [1, 1]} : vector<16x32xf32> to vector<2x32xf32>
    %cst_44 = arith.constant dense<0.000000e+00> : vector<2x32xf32>
    %118 = tpu.matmul %77, %17, %cst_44 {dimension_numbers = #tpu.dot_dimension_numbers<[1], [0], [0], [1], [0, 0, 1, 1], [], []>} : vector<2x32xf32>, vector<32x32xf32>, vector<2x32xf32> -> vector<2x32xf32>
    %119 = vector.broadcast %19 : vector<1x32xf32> to vector<2x32xf32>
    %120 = arith.addf %118, %119 : vector<2x32xf32>
    %121 = arith.mulf %108, %120 : vector<2x32xf32>
    %122 = arith.addf %117, %121 : vector<2x32xf32>
    %123 = math.tanh %122 : vector<2x32xf32>
    %cst_45 = arith.constant 1.000000e+00 : f32
    %124 = vector.broadcast %cst_45 : f32 to vector<2x32xf32>
    %125 = arith.subf %124, %93 : vector<2x32xf32>
    %126 = arith.mulf %125, %100 : vector<2x32xf32>
    %127 = arith.mulf %93, %72 : vector<2x32xf32>
    %128 = arith.addf %126, %127 : vector<2x32xf32>
    %cst_46 = arith.constant 1.000000e+00 : f32
    %129 = vector.broadcast %cst_46 : f32 to vector<2x32xf32>
    %130 = arith.subf %129, %116 : vector<2x32xf32>
    %131 = arith.mulf %130, %123 : vector<2x32xf32>
    %132 = arith.mulf %116, %77 : vector<2x32xf32>
    %133 = arith.addf %131, %132 : vector<2x32xf32>
    %134 = vector.extract_strided_slice %6 {offsets = [4, 0], sizes = [2, 32], strides = [1, 1]} : vector<16x32xf32> to vector<2x32xf32>
    %cst_47 = arith.constant dense<0.000000e+00> : vector<2x32xf32>
    %135 = tpu.matmul %128, %12, %cst_47 {dimension_numbers = #tpu.dot_dimension_numbers<[1], [0], [0], [1], [0, 0, 1, 1], [], []>} : vector<2x32xf32>, vector<32x32xf32>, vector<2x32xf32> -> vector<2x32xf32>
    %136 = arith.addf %134, %135 : vector<2x32xf32>
    %137 = arith.negf %136 : vector<2x32xf32>
    %138 = math.exp %137 : vector<2x32xf32>
    %cst_48 = arith.constant 1.000000e+00 : f32
    %139 = vector.broadcast %cst_48 : f32 to vector<2x32xf32>
    %140 = arith.addf %139, %138 : vector<2x32xf32>
    %141 = arith.divf %139, %140 : vector<2x32xf32>
    %142 = vector.extract_strided_slice %7 {offsets = [4, 0], sizes = [2, 32], strides = [1, 1]} : vector<16x32xf32> to vector<2x32xf32>
    %cst_49 = arith.constant dense<0.000000e+00> : vector<2x32xf32>
    %143 = tpu.matmul %128, %13, %cst_49 {dimension_numbers = #tpu.dot_dimension_numbers<[1], [0], [0], [1], [0, 0, 1, 1], [], []>} : vector<2x32xf32>, vector<32x32xf32>, vector<2x32xf32> -> vector<2x32xf32>
    %144 = arith.addf %142, %143 : vector<2x32xf32>
    %145 = arith.negf %144 : vector<2x32xf32>
    %146 = math.exp %145 : vector<2x32xf32>
    %cst_50 = arith.constant 1.000000e+00 : f32
    %147 = vector.broadcast %cst_50 : f32 to vector<2x32xf32>
    %148 = arith.addf %147, %146 : vector<2x32xf32>
    %149 = arith.divf %147, %148 : vector<2x32xf32>
    %150 = vector.extract_strided_slice %8 {offsets = [4, 0], sizes = [2, 32], strides = [1, 1]} : vector<16x32xf32> to vector<2x32xf32>
    %cst_51 = arith.constant dense<0.000000e+00> : vector<2x32xf32>
    %151 = tpu.matmul %128, %14, %cst_51 {dimension_numbers = #tpu.dot_dimension_numbers<[1], [0], [0], [1], [0, 0, 1, 1], [], []>} : vector<2x32xf32>, vector<32x32xf32>, vector<2x32xf32> -> vector<2x32xf32>
    %152 = vector.broadcast %18 : vector<1x32xf32> to vector<2x32xf32>
    %153 = arith.addf %151, %152 : vector<2x32xf32>
    %154 = arith.mulf %141, %153 : vector<2x32xf32>
    %155 = arith.addf %150, %154 : vector<2x32xf32>
    %156 = math.tanh %155 : vector<2x32xf32>
    %157 = vector.extract_strided_slice %9 {offsets = [10, 0], sizes = [2, 32], strides = [1, 1]} : vector<16x32xf32> to vector<2x32xf32>
    %cst_52 = arith.constant dense<0.000000e+00> : vector<2x32xf32>
    %158 = tpu.matmul %133, %15, %cst_52 {dimension_numbers = #tpu.dot_dimension_numbers<[1], [0], [0], [1], [0, 0, 1, 1], [], []>} : vector<2x32xf32>, vector<32x32xf32>, vector<2x32xf32> -> vector<2x32xf32>
    %159 = arith.addf %157, %158 : vector<2x32xf32>
    %160 = arith.negf %159 : vector<2x32xf32>
    %161 = math.exp %160 : vector<2x32xf32>
    %cst_53 = arith.constant 1.000000e+00 : f32
    %162 = vector.broadcast %cst_53 : f32 to vector<2x32xf32>
    %163 = arith.addf %162, %161 : vector<2x32xf32>
    %164 = arith.divf %162, %163 : vector<2x32xf32>
    %165 = vector.extract_strided_slice %10 {offsets = [10, 0], sizes = [2, 32], strides = [1, 1]} : vector<16x32xf32> to vector<2x32xf32>
    %cst_54 = arith.constant dense<0.000000e+00> : vector<2x32xf32>
    %166 = tpu.matmul %133, %16, %cst_54 {dimension_numbers = #tpu.dot_dimension_numbers<[1], [0], [0], [1], [0, 0, 1, 1], [], []>} : vector<2x32xf32>, vector<32x32xf32>, vector<2x32xf32> -> vector<2x32xf32>
    %167 = arith.addf %165, %166 : vector<2x32xf32>
    %168 = arith.negf %167 : vector<2x32xf32>
    %169 = math.exp %168 : vector<2x32xf32>
    %cst_55 = arith.constant 1.000000e+00 : f32
    %170 = vector.broadcast %cst_55 : f32 to vector<2x32xf32>
    %171 = arith.addf %170, %169 : vector<2x32xf32>
    %172 = arith.divf %170, %171 : vector<2x32xf32>
    %173 = vector.extract_strided_slice %11 {offsets = [10, 0], sizes = [2, 32], strides = [1, 1]} : vector<16x32xf32> to vector<2x32xf32>
    %cst_56 = arith.constant dense<0.000000e+00> : vector<2x32xf32>
    %174 = tpu.matmul %133, %17, %cst_56 {dimension_numbers = #tpu.dot_dimension_numbers<[1], [0], [0], [1], [0, 0, 1, 1], [], []>} : vector<2x32xf32>, vector<32x32xf32>, vector<2x32xf32> -> vector<2x32xf32>
    %175 = vector.broadcast %19 : vector<1x32xf32> to vector<2x32xf32>
    %176 = arith.addf %174, %175 : vector<2x32xf32>
    %177 = arith.mulf %164, %176 : vector<2x32xf32>
    %178 = arith.addf %173, %177 : vector<2x32xf32>
    %179 = math.tanh %178 : vector<2x32xf32>
    %cst_57 = arith.constant 1.000000e+00 : f32
    %180 = vector.broadcast %cst_57 : f32 to vector<2x32xf32>
    %181 = arith.subf %180, %149 : vector<2x32xf32>
    %182 = arith.mulf %181, %156 : vector<2x32xf32>
    %183 = arith.mulf %149, %128 : vector<2x32xf32>
    %184 = arith.addf %182, %183 : vector<2x32xf32>
    %cst_58 = arith.constant 1.000000e+00 : f32
    %185 = vector.broadcast %cst_58 : f32 to vector<2x32xf32>
    %186 = arith.subf %185, %172 : vector<2x32xf32>
    %187 = arith.mulf %186, %179 : vector<2x32xf32>
    %188 = arith.mulf %172, %133 : vector<2x32xf32>
    %189 = arith.addf %187, %188 : vector<2x32xf32>
    %190 = vector.extract_strided_slice %6 {offsets = [6, 0], sizes = [2, 32], strides = [1, 1]} : vector<16x32xf32> to vector<2x32xf32>
    %cst_59 = arith.constant dense<0.000000e+00> : vector<2x32xf32>
    %191 = tpu.matmul %184, %12, %cst_59 {dimension_numbers = #tpu.dot_dimension_numbers<[1], [0], [0], [1], [0, 0, 1, 1], [], []>} : vector<2x32xf32>, vector<32x32xf32>, vector<2x32xf32> -> vector<2x32xf32>
    %192 = arith.addf %190, %191 : vector<2x32xf32>
    %193 = arith.negf %192 : vector<2x32xf32>
    %194 = math.exp %193 : vector<2x32xf32>
    %cst_60 = arith.constant 1.000000e+00 : f32
    %195 = vector.broadcast %cst_60 : f32 to vector<2x32xf32>
    %196 = arith.addf %195, %194 : vector<2x32xf32>
    %197 = arith.divf %195, %196 : vector<2x32xf32>
    %198 = vector.extract_strided_slice %7 {offsets = [6, 0], sizes = [2, 32], strides = [1, 1]} : vector<16x32xf32> to vector<2x32xf32>
    %cst_61 = arith.constant dense<0.000000e+00> : vector<2x32xf32>
    %199 = tpu.matmul %184, %13, %cst_61 {dimension_numbers = #tpu.dot_dimension_numbers<[1], [0], [0], [1], [0, 0, 1, 1], [], []>} : vector<2x32xf32>, vector<32x32xf32>, vector<2x32xf32> -> vector<2x32xf32>
    %200 = arith.addf %198, %199 : vector<2x32xf32>
    %201 = arith.negf %200 : vector<2x32xf32>
    %202 = math.exp %201 : vector<2x32xf32>
    %cst_62 = arith.constant 1.000000e+00 : f32
    %203 = vector.broadcast %cst_62 : f32 to vector<2x32xf32>
    %204 = arith.addf %203, %202 : vector<2x32xf32>
    %205 = arith.divf %203, %204 : vector<2x32xf32>
    %206 = vector.extract_strided_slice %8 {offsets = [6, 0], sizes = [2, 32], strides = [1, 1]} : vector<16x32xf32> to vector<2x32xf32>
    %cst_63 = arith.constant dense<0.000000e+00> : vector<2x32xf32>
    %207 = tpu.matmul %184, %14, %cst_63 {dimension_numbers = #tpu.dot_dimension_numbers<[1], [0], [0], [1], [0, 0, 1, 1], [], []>} : vector<2x32xf32>, vector<32x32xf32>, vector<2x32xf32> -> vector<2x32xf32>
    %208 = vector.broadcast %18 : vector<1x32xf32> to vector<2x32xf32>
    %209 = arith.addf %207, %208 : vector<2x32xf32>
    %210 = arith.mulf %197, %209 : vector<2x32xf32>
    %211 = arith.addf %206, %210 : vector<2x32xf32>
    %212 = math.tanh %211 : vector<2x32xf32>
    %213 = vector.extract_strided_slice %9 {offsets = [8, 0], sizes = [2, 32], strides = [1, 1]} : vector<16x32xf32> to vector<2x32xf32>
    %cst_64 = arith.constant dense<0.000000e+00> : vector<2x32xf32>
    %214 = tpu.matmul %189, %15, %cst_64 {dimension_numbers = #tpu.dot_dimension_numbers<[1], [0], [0], [1], [0, 0, 1, 1], [], []>} : vector<2x32xf32>, vector<32x32xf32>, vector<2x32xf32> -> vector<2x32xf32>
    %215 = arith.addf %213, %214 : vector<2x32xf32>
    %216 = arith.negf %215 : vector<2x32xf32>
    %217 = math.exp %216 : vector<2x32xf32>
    %cst_65 = arith.constant 1.000000e+00 : f32
    %218 = vector.broadcast %cst_65 : f32 to vector<2x32xf32>
    %219 = arith.addf %218, %217 : vector<2x32xf32>
    %220 = arith.divf %218, %219 : vector<2x32xf32>
    %221 = vector.extract_strided_slice %10 {offsets = [8, 0], sizes = [2, 32], strides = [1, 1]} : vector<16x32xf32> to vector<2x32xf32>
    %cst_66 = arith.constant dense<0.000000e+00> : vector<2x32xf32>
    %222 = tpu.matmul %189, %16, %cst_66 {dimension_numbers = #tpu.dot_dimension_numbers<[1], [0], [0], [1], [0, 0, 1, 1], [], []>} : vector<2x32xf32>, vector<32x32xf32>, vector<2x32xf32> -> vector<2x32xf32>
    %223 = arith.addf %221, %222 : vector<2x32xf32>
    %224 = arith.negf %223 : vector<2x32xf32>
    %225 = math.exp %224 : vector<2x32xf32>
    %cst_67 = arith.constant 1.000000e+00 : f32
    %226 = vector.broadcast %cst_67 : f32 to vector<2x32xf32>
    %227 = arith.addf %226, %225 : vector<2x32xf32>
    %228 = arith.divf %226, %227 : vector<2x32xf32>
    %229 = vector.extract_strided_slice %11 {offsets = [8, 0], sizes = [2, 32], strides = [1, 1]} : vector<16x32xf32> to vector<2x32xf32>
    %cst_68 = arith.constant dense<0.000000e+00> : vector<2x32xf32>
    %230 = tpu.matmul %189, %17, %cst_68 {dimension_numbers = #tpu.dot_dimension_numbers<[1], [0], [0], [1], [0, 0, 1, 1], [], []>} : vector<2x32xf32>, vector<32x32xf32>, vector<2x32xf32> -> vector<2x32xf32>
    %231 = vector.broadcast %19 : vector<1x32xf32> to vector<2x32xf32>
    %232 = arith.addf %230, %231 : vector<2x32xf32>
    %233 = arith.mulf %220, %232 : vector<2x32xf32>
    %234 = arith.addf %229, %233 : vector<2x32xf32>
    %235 = math.tanh %234 : vector<2x32xf32>
    %cst_69 = arith.constant 1.000000e+00 : f32
    %236 = vector.broadcast %cst_69 : f32 to vector<2x32xf32>
    %237 = arith.subf %236, %205 : vector<2x32xf32>
    %238 = arith.mulf %237, %212 : vector<2x32xf32>
    %239 = arith.mulf %205, %184 : vector<2x32xf32>
    %240 = arith.addf %238, %239 : vector<2x32xf32>
    %cst_70 = arith.constant 1.000000e+00 : f32
    %241 = vector.broadcast %cst_70 : f32 to vector<2x32xf32>
    %242 = arith.subf %241, %228 : vector<2x32xf32>
    %243 = arith.mulf %242, %235 : vector<2x32xf32>
    %244 = arith.mulf %228, %189 : vector<2x32xf32>
    %245 = arith.addf %243, %244 : vector<2x32xf32>
    %246 = vector.extract_strided_slice %6 {offsets = [8, 0], sizes = [2, 32], strides = [1, 1]} : vector<16x32xf32> to vector<2x32xf32>
    %cst_71 = arith.constant dense<0.000000e+00> : vector<2x32xf32>
    %247 = tpu.matmul %240, %12, %cst_71 {dimension_numbers = #tpu.dot_dimension_numbers<[1], [0], [0], [1], [0, 0, 1, 1], [], []>} : vector<2x32xf32>, vector<32x32xf32>, vector<2x32xf32> -> vector<2x32xf32>
    %248 = arith.addf %246, %247 : vector<2x32xf32>
    %249 = arith.negf %248 : vector<2x32xf32>
    %250 = math.exp %249 : vector<2x32xf32>
    %cst_72 = arith.constant 1.000000e+00 : f32
    %251 = vector.broadcast %cst_72 : f32 to vector<2x32xf32>
    %252 = arith.addf %251, %250 : vector<2x32xf32>
    %253 = arith.divf %251, %252 : vector<2x32xf32>
    %254 = vector.extract_strided_slice %7 {offsets = [8, 0], sizes = [2, 32], strides = [1, 1]} : vector<16x32xf32> to vector<2x32xf32>
    %cst_73 = arith.constant dense<0.000000e+00> : vector<2x32xf32>
    %255 = tpu.matmul %240, %13, %cst_73 {dimension_numbers = #tpu.dot_dimension_numbers<[1], [0], [0], [1], [0, 0, 1, 1], [], []>} : vector<2x32xf32>, vector<32x32xf32>, vector<2x32xf32> -> vector<2x32xf32>
    %256 = arith.addf %254, %255 : vector<2x32xf32>
    %257 = arith.negf %256 : vector<2x32xf32>
    %258 = math.exp %257 : vector<2x32xf32>
    %cst_74 = arith.constant 1.000000e+00 : f32
    %259 = vector.broadcast %cst_74 : f32 to vector<2x32xf32>
    %260 = arith.addf %259, %258 : vector<2x32xf32>
    %261 = arith.divf %259, %260 : vector<2x32xf32>
    %262 = vector.extract_strided_slice %8 {offsets = [8, 0], sizes = [2, 32], strides = [1, 1]} : vector<16x32xf32> to vector<2x32xf32>
    %cst_75 = arith.constant dense<0.000000e+00> : vector<2x32xf32>
    %263 = tpu.matmul %240, %14, %cst_75 {dimension_numbers = #tpu.dot_dimension_numbers<[1], [0], [0], [1], [0, 0, 1, 1], [], []>} : vector<2x32xf32>, vector<32x32xf32>, vector<2x32xf32> -> vector<2x32xf32>
    %264 = vector.broadcast %18 : vector<1x32xf32> to vector<2x32xf32>
    %265 = arith.addf %263, %264 : vector<2x32xf32>
    %266 = arith.mulf %253, %265 : vector<2x32xf32>
    %267 = arith.addf %262, %266 : vector<2x32xf32>
    %268 = math.tanh %267 : vector<2x32xf32>
    %269 = vector.extract_strided_slice %9 {offsets = [6, 0], sizes = [2, 32], strides = [1, 1]} : vector<16x32xf32> to vector<2x32xf32>
    %cst_76 = arith.constant dense<0.000000e+00> : vector<2x32xf32>
    %270 = tpu.matmul %245, %15, %cst_76 {dimension_numbers = #tpu.dot_dimension_numbers<[1], [0], [0], [1], [0, 0, 1, 1], [], []>} : vector<2x32xf32>, vector<32x32xf32>, vector<2x32xf32> -> vector<2x32xf32>
    %271 = arith.addf %269, %270 : vector<2x32xf32>
    %272 = arith.negf %271 : vector<2x32xf32>
    %273 = math.exp %272 : vector<2x32xf32>
    %cst_77 = arith.constant 1.000000e+00 : f32
    %274 = vector.broadcast %cst_77 : f32 to vector<2x32xf32>
    %275 = arith.addf %274, %273 : vector<2x32xf32>
    %276 = arith.divf %274, %275 : vector<2x32xf32>
    %277 = vector.extract_strided_slice %10 {offsets = [6, 0], sizes = [2, 32], strides = [1, 1]} : vector<16x32xf32> to vector<2x32xf32>
    %cst_78 = arith.constant dense<0.000000e+00> : vector<2x32xf32>
    %278 = tpu.matmul %245, %16, %cst_78 {dimension_numbers = #tpu.dot_dimension_numbers<[1], [0], [0], [1], [0, 0, 1, 1], [], []>} : vector<2x32xf32>, vector<32x32xf32>, vector<2x32xf32> -> vector<2x32xf32>
    %279 = arith.addf %277, %278 : vector<2x32xf32>
    %280 = arith.negf %279 : vector<2x32xf32>
    %281 = math.exp %280 : vector<2x32xf32>
    %cst_79 = arith.constant 1.000000e+00 : f32
    %282 = vector.broadcast %cst_79 : f32 to vector<2x32xf32>
    %283 = arith.addf %282, %281 : vector<2x32xf32>
    %284 = arith.divf %282, %283 : vector<2x32xf32>
    %285 = vector.extract_strided_slice %11 {offsets = [6, 0], sizes = [2, 32], strides = [1, 1]} : vector<16x32xf32> to vector<2x32xf32>
    %cst_80 = arith.constant dense<0.000000e+00> : vector<2x32xf32>
    %286 = tpu.matmul %245, %17, %cst_80 {dimension_numbers = #tpu.dot_dimension_numbers<[1], [0], [0], [1], [0, 0, 1, 1], [], []>} : vector<2x32xf32>, vector<32x32xf32>, vector<2x32xf32> -> vector<2x32xf32>
    %287 = vector.broadcast %19 : vector<1x32xf32> to vector<2x32xf32>
    %288 = arith.addf %286, %287 : vector<2x32xf32>
    %289 = arith.mulf %276, %288 : vector<2x32xf32>
    %290 = arith.addf %285, %289 : vector<2x32xf32>
    %291 = math.tanh %290 : vector<2x32xf32>
    %cst_81 = arith.constant 1.000000e+00 : f32
    %292 = vector.broadcast %cst_81 : f32 to vector<2x32xf32>
    %293 = arith.subf %292, %261 : vector<2x32xf32>
    %294 = arith.mulf %293, %268 : vector<2x32xf32>
    %295 = arith.mulf %261, %240 : vector<2x32xf32>
    %296 = arith.addf %294, %295 : vector<2x32xf32>
    %cst_82 = arith.constant 1.000000e+00 : f32
    %297 = vector.broadcast %cst_82 : f32 to vector<2x32xf32>
    %298 = arith.subf %297, %284 : vector<2x32xf32>
    %299 = arith.mulf %298, %291 : vector<2x32xf32>
    %300 = arith.mulf %284, %245 : vector<2x32xf32>
    %301 = arith.addf %299, %300 : vector<2x32xf32>
    %302 = vector.extract_strided_slice %6 {offsets = [10, 0], sizes = [2, 32], strides = [1, 1]} : vector<16x32xf32> to vector<2x32xf32>
    %cst_83 = arith.constant dense<0.000000e+00> : vector<2x32xf32>
    %303 = tpu.matmul %296, %12, %cst_83 {dimension_numbers = #tpu.dot_dimension_numbers<[1], [0], [0], [1], [0, 0, 1, 1], [], []>} : vector<2x32xf32>, vector<32x32xf32>, vector<2x32xf32> -> vector<2x32xf32>
    %304 = arith.addf %302, %303 : vector<2x32xf32>
    %305 = arith.negf %304 : vector<2x32xf32>
    %306 = math.exp %305 : vector<2x32xf32>
    %cst_84 = arith.constant 1.000000e+00 : f32
    %307 = vector.broadcast %cst_84 : f32 to vector<2x32xf32>
    %308 = arith.addf %307, %306 : vector<2x32xf32>
    %309 = arith.divf %307, %308 : vector<2x32xf32>
    %310 = vector.extract_strided_slice %7 {offsets = [10, 0], sizes = [2, 32], strides = [1, 1]} : vector<16x32xf32> to vector<2x32xf32>
    %cst_85 = arith.constant dense<0.000000e+00> : vector<2x32xf32>
    %311 = tpu.matmul %296, %13, %cst_85 {dimension_numbers = #tpu.dot_dimension_numbers<[1], [0], [0], [1], [0, 0, 1, 1], [], []>} : vector<2x32xf32>, vector<32x32xf32>, vector<2x32xf32> -> vector<2x32xf32>
    %312 = arith.addf %310, %311 : vector<2x32xf32>
    %313 = arith.negf %312 : vector<2x32xf32>
    %314 = math.exp %313 : vector<2x32xf32>
    %cst_86 = arith.constant 1.000000e+00 : f32
    %315 = vector.broadcast %cst_86 : f32 to vector<2x32xf32>
    %316 = arith.addf %315, %314 : vector<2x32xf32>
    %317 = arith.divf %315, %316 : vector<2x32xf32>
    %318 = vector.extract_strided_slice %8 {offsets = [10, 0], sizes = [2, 32], strides = [1, 1]} : vector<16x32xf32> to vector<2x32xf32>
    %cst_87 = arith.constant dense<0.000000e+00> : vector<2x32xf32>
    %319 = tpu.matmul %296, %14, %cst_87 {dimension_numbers = #tpu.dot_dimension_numbers<[1], [0], [0], [1], [0, 0, 1, 1], [], []>} : vector<2x32xf32>, vector<32x32xf32>, vector<2x32xf32> -> vector<2x32xf32>
    %320 = vector.broadcast %18 : vector<1x32xf32> to vector<2x32xf32>
    %321 = arith.addf %319, %320 : vector<2x32xf32>
    %322 = arith.mulf %309, %321 : vector<2x32xf32>
    %323 = arith.addf %318, %322 : vector<2x32xf32>
    %324 = math.tanh %323 : vector<2x32xf32>
    %325 = vector.extract_strided_slice %9 {offsets = [4, 0], sizes = [2, 32], strides = [1, 1]} : vector<16x32xf32> to vector<2x32xf32>
    %cst_88 = arith.constant dense<0.000000e+00> : vector<2x32xf32>
    %326 = tpu.matmul %301, %15, %cst_88 {dimension_numbers = #tpu.dot_dimension_numbers<[1], [0], [0], [1], [0, 0, 1, 1], [], []>} : vector<2x32xf32>, vector<32x32xf32>, vector<2x32xf32> -> vector<2x32xf32>
    %327 = arith.addf %325, %326 : vector<2x32xf32>
    %328 = arith.negf %327 : vector<2x32xf32>
    %329 = math.exp %328 : vector<2x32xf32>
    %cst_89 = arith.constant 1.000000e+00 : f32
    %330 = vector.broadcast %cst_89 : f32 to vector<2x32xf32>
    %331 = arith.addf %330, %329 : vector<2x32xf32>
    %332 = arith.divf %330, %331 : vector<2x32xf32>
    %333 = vector.extract_strided_slice %10 {offsets = [4, 0], sizes = [2, 32], strides = [1, 1]} : vector<16x32xf32> to vector<2x32xf32>
    %cst_90 = arith.constant dense<0.000000e+00> : vector<2x32xf32>
    %334 = tpu.matmul %301, %16, %cst_90 {dimension_numbers = #tpu.dot_dimension_numbers<[1], [0], [0], [1], [0, 0, 1, 1], [], []>} : vector<2x32xf32>, vector<32x32xf32>, vector<2x32xf32> -> vector<2x32xf32>
    %335 = arith.addf %333, %334 : vector<2x32xf32>
    %336 = arith.negf %335 : vector<2x32xf32>
    %337 = math.exp %336 : vector<2x32xf32>
    %cst_91 = arith.constant 1.000000e+00 : f32
    %338 = vector.broadcast %cst_91 : f32 to vector<2x32xf32>
    %339 = arith.addf %338, %337 : vector<2x32xf32>
    %340 = arith.divf %338, %339 : vector<2x32xf32>
    %341 = vector.extract_strided_slice %11 {offsets = [4, 0], sizes = [2, 32], strides = [1, 1]} : vector<16x32xf32> to vector<2x32xf32>
    %cst_92 = arith.constant dense<0.000000e+00> : vector<2x32xf32>
    %342 = tpu.matmul %301, %17, %cst_92 {dimension_numbers = #tpu.dot_dimension_numbers<[1], [0], [0], [1], [0, 0, 1, 1], [], []>} : vector<2x32xf32>, vector<32x32xf32>, vector<2x32xf32> -> vector<2x32xf32>
    %343 = vector.broadcast %19 : vector<1x32xf32> to vector<2x32xf32>
    %344 = arith.addf %342, %343 : vector<2x32xf32>
    %345 = arith.mulf %332, %344 : vector<2x32xf32>
    %346 = arith.addf %341, %345 : vector<2x32xf32>
    %347 = math.tanh %346 : vector<2x32xf32>
    %cst_93 = arith.constant 1.000000e+00 : f32
    %348 = vector.broadcast %cst_93 : f32 to vector<2x32xf32>
    %349 = arith.subf %348, %317 : vector<2x32xf32>
    %350 = arith.mulf %349, %324 : vector<2x32xf32>
    %351 = arith.mulf %317, %296 : vector<2x32xf32>
    %352 = arith.addf %350, %351 : vector<2x32xf32>
    %cst_94 = arith.constant 1.000000e+00 : f32
    %353 = vector.broadcast %cst_94 : f32 to vector<2x32xf32>
    %354 = arith.subf %353, %340 : vector<2x32xf32>
    %355 = arith.mulf %354, %347 : vector<2x32xf32>
    %356 = arith.mulf %340, %301 : vector<2x32xf32>
    %357 = arith.addf %355, %356 : vector<2x32xf32>
    %358 = vector.extract_strided_slice %6 {offsets = [12, 0], sizes = [2, 32], strides = [1, 1]} : vector<16x32xf32> to vector<2x32xf32>
    %cst_95 = arith.constant dense<0.000000e+00> : vector<2x32xf32>
    %359 = tpu.matmul %352, %12, %cst_95 {dimension_numbers = #tpu.dot_dimension_numbers<[1], [0], [0], [1], [0, 0, 1, 1], [], []>} : vector<2x32xf32>, vector<32x32xf32>, vector<2x32xf32> -> vector<2x32xf32>
    %360 = arith.addf %358, %359 : vector<2x32xf32>
    %361 = arith.negf %360 : vector<2x32xf32>
    %362 = math.exp %361 : vector<2x32xf32>
    %cst_96 = arith.constant 1.000000e+00 : f32
    %363 = vector.broadcast %cst_96 : f32 to vector<2x32xf32>
    %364 = arith.addf %363, %362 : vector<2x32xf32>
    %365 = arith.divf %363, %364 : vector<2x32xf32>
    %366 = vector.extract_strided_slice %7 {offsets = [12, 0], sizes = [2, 32], strides = [1, 1]} : vector<16x32xf32> to vector<2x32xf32>
    %cst_97 = arith.constant dense<0.000000e+00> : vector<2x32xf32>
    %367 = tpu.matmul %352, %13, %cst_97 {dimension_numbers = #tpu.dot_dimension_numbers<[1], [0], [0], [1], [0, 0, 1, 1], [], []>} : vector<2x32xf32>, vector<32x32xf32>, vector<2x32xf32> -> vector<2x32xf32>
    %368 = arith.addf %366, %367 : vector<2x32xf32>
    %369 = arith.negf %368 : vector<2x32xf32>
    %370 = math.exp %369 : vector<2x32xf32>
    %cst_98 = arith.constant 1.000000e+00 : f32
    %371 = vector.broadcast %cst_98 : f32 to vector<2x32xf32>
    %372 = arith.addf %371, %370 : vector<2x32xf32>
    %373 = arith.divf %371, %372 : vector<2x32xf32>
    %374 = vector.extract_strided_slice %8 {offsets = [12, 0], sizes = [2, 32], strides = [1, 1]} : vector<16x32xf32> to vector<2x32xf32>
    %cst_99 = arith.constant dense<0.000000e+00> : vector<2x32xf32>
    %375 = tpu.matmul %352, %14, %cst_99 {dimension_numbers = #tpu.dot_dimension_numbers<[1], [0], [0], [1], [0, 0, 1, 1], [], []>} : vector<2x32xf32>, vector<32x32xf32>, vector<2x32xf32> -> vector<2x32xf32>
    %376 = vector.broadcast %18 : vector<1x32xf32> to vector<2x32xf32>
    %377 = arith.addf %375, %376 : vector<2x32xf32>
    %378 = arith.mulf %365, %377 : vector<2x32xf32>
    %379 = arith.addf %374, %378 : vector<2x32xf32>
    %380 = math.tanh %379 : vector<2x32xf32>
    %381 = vector.extract_strided_slice %9 {offsets = [2, 0], sizes = [2, 32], strides = [1, 1]} : vector<16x32xf32> to vector<2x32xf32>
    %cst_100 = arith.constant dense<0.000000e+00> : vector<2x32xf32>
    %382 = tpu.matmul %357, %15, %cst_100 {dimension_numbers = #tpu.dot_dimension_numbers<[1], [0], [0], [1], [0, 0, 1, 1], [], []>} : vector<2x32xf32>, vector<32x32xf32>, vector<2x32xf32> -> vector<2x32xf32>
    %383 = arith.addf %381, %382 : vector<2x32xf32>
    %384 = arith.negf %383 : vector<2x32xf32>
    %385 = math.exp %384 : vector<2x32xf32>
    %cst_101 = arith.constant 1.000000e+00 : f32
    %386 = vector.broadcast %cst_101 : f32 to vector<2x32xf32>
    %387 = arith.addf %386, %385 : vector<2x32xf32>
    %388 = arith.divf %386, %387 : vector<2x32xf32>
    %389 = vector.extract_strided_slice %10 {offsets = [2, 0], sizes = [2, 32], strides = [1, 1]} : vector<16x32xf32> to vector<2x32xf32>
    %cst_102 = arith.constant dense<0.000000e+00> : vector<2x32xf32>
    %390 = tpu.matmul %357, %16, %cst_102 {dimension_numbers = #tpu.dot_dimension_numbers<[1], [0], [0], [1], [0, 0, 1, 1], [], []>} : vector<2x32xf32>, vector<32x32xf32>, vector<2x32xf32> -> vector<2x32xf32>
    %391 = arith.addf %389, %390 : vector<2x32xf32>
    %392 = arith.negf %391 : vector<2x32xf32>
    %393 = math.exp %392 : vector<2x32xf32>
    %cst_103 = arith.constant 1.000000e+00 : f32
    %394 = vector.broadcast %cst_103 : f32 to vector<2x32xf32>
    %395 = arith.addf %394, %393 : vector<2x32xf32>
    %396 = arith.divf %394, %395 : vector<2x32xf32>
    %397 = vector.extract_strided_slice %11 {offsets = [2, 0], sizes = [2, 32], strides = [1, 1]} : vector<16x32xf32> to vector<2x32xf32>
    %cst_104 = arith.constant dense<0.000000e+00> : vector<2x32xf32>
    %398 = tpu.matmul %357, %17, %cst_104 {dimension_numbers = #tpu.dot_dimension_numbers<[1], [0], [0], [1], [0, 0, 1, 1], [], []>} : vector<2x32xf32>, vector<32x32xf32>, vector<2x32xf32> -> vector<2x32xf32>
    %399 = vector.broadcast %19 : vector<1x32xf32> to vector<2x32xf32>
    %400 = arith.addf %398, %399 : vector<2x32xf32>
    %401 = arith.mulf %388, %400 : vector<2x32xf32>
    %402 = arith.addf %397, %401 : vector<2x32xf32>
    %403 = math.tanh %402 : vector<2x32xf32>
    %cst_105 = arith.constant 1.000000e+00 : f32
    %404 = vector.broadcast %cst_105 : f32 to vector<2x32xf32>
    %405 = arith.subf %404, %373 : vector<2x32xf32>
    %406 = arith.mulf %405, %380 : vector<2x32xf32>
    %407 = arith.mulf %373, %352 : vector<2x32xf32>
    %408 = arith.addf %406, %407 : vector<2x32xf32>
    %cst_106 = arith.constant 1.000000e+00 : f32
    %409 = vector.broadcast %cst_106 : f32 to vector<2x32xf32>
    %410 = arith.subf %409, %396 : vector<2x32xf32>
    %411 = arith.mulf %410, %403 : vector<2x32xf32>
    %412 = arith.mulf %396, %357 : vector<2x32xf32>
    %413 = arith.addf %411, %412 : vector<2x32xf32>
    %414 = vector.extract_strided_slice %6 {offsets = [14, 0], sizes = [2, 32], strides = [1, 1]} : vector<16x32xf32> to vector<2x32xf32>
    %cst_107 = arith.constant dense<0.000000e+00> : vector<2x32xf32>
    %415 = tpu.matmul %408, %12, %cst_107 {dimension_numbers = #tpu.dot_dimension_numbers<[1], [0], [0], [1], [0, 0, 1, 1], [], []>} : vector<2x32xf32>, vector<32x32xf32>, vector<2x32xf32> -> vector<2x32xf32>
    %416 = arith.addf %414, %415 : vector<2x32xf32>
    %417 = arith.negf %416 : vector<2x32xf32>
    %418 = math.exp %417 : vector<2x32xf32>
    %cst_108 = arith.constant 1.000000e+00 : f32
    %419 = vector.broadcast %cst_108 : f32 to vector<2x32xf32>
    %420 = arith.addf %419, %418 : vector<2x32xf32>
    %421 = arith.divf %419, %420 : vector<2x32xf32>
    %422 = vector.extract_strided_slice %7 {offsets = [14, 0], sizes = [2, 32], strides = [1, 1]} : vector<16x32xf32> to vector<2x32xf32>
    %cst_109 = arith.constant dense<0.000000e+00> : vector<2x32xf32>
    %423 = tpu.matmul %408, %13, %cst_109 {dimension_numbers = #tpu.dot_dimension_numbers<[1], [0], [0], [1], [0, 0, 1, 1], [], []>} : vector<2x32xf32>, vector<32x32xf32>, vector<2x32xf32> -> vector<2x32xf32>
    %424 = arith.addf %422, %423 : vector<2x32xf32>
    %425 = arith.negf %424 : vector<2x32xf32>
    %426 = math.exp %425 : vector<2x32xf32>
    %cst_110 = arith.constant 1.000000e+00 : f32
    %427 = vector.broadcast %cst_110 : f32 to vector<2x32xf32>
    %428 = arith.addf %427, %426 : vector<2x32xf32>
    %429 = arith.divf %427, %428 : vector<2x32xf32>
    %430 = vector.extract_strided_slice %8 {offsets = [14, 0], sizes = [2, 32], strides = [1, 1]} : vector<16x32xf32> to vector<2x32xf32>
    %cst_111 = arith.constant dense<0.000000e+00> : vector<2x32xf32>
    %431 = tpu.matmul %408, %14, %cst_111 {dimension_numbers = #tpu.dot_dimension_numbers<[1], [0], [0], [1], [0, 0, 1, 1], [], []>} : vector<2x32xf32>, vector<32x32xf32>, vector<2x32xf32> -> vector<2x32xf32>
    %432 = vector.broadcast %18 : vector<1x32xf32> to vector<2x32xf32>
    %433 = arith.addf %431, %432 : vector<2x32xf32>
    %434 = arith.mulf %421, %433 : vector<2x32xf32>
    %435 = arith.addf %430, %434 : vector<2x32xf32>
    %436 = math.tanh %435 : vector<2x32xf32>
    %437 = vector.extract_strided_slice %9 {offsets = [0, 0], sizes = [2, 32], strides = [1, 1]} : vector<16x32xf32> to vector<2x32xf32>
    %cst_112 = arith.constant dense<0.000000e+00> : vector<2x32xf32>
    %438 = tpu.matmul %413, %15, %cst_112 {dimension_numbers = #tpu.dot_dimension_numbers<[1], [0], [0], [1], [0, 0, 1, 1], [], []>} : vector<2x32xf32>, vector<32x32xf32>, vector<2x32xf32> -> vector<2x32xf32>
    %439 = arith.addf %437, %438 : vector<2x32xf32>
    %440 = arith.negf %439 : vector<2x32xf32>
    %441 = math.exp %440 : vector<2x32xf32>
    %cst_113 = arith.constant 1.000000e+00 : f32
    %442 = vector.broadcast %cst_113 : f32 to vector<2x32xf32>
    %443 = arith.addf %442, %441 : vector<2x32xf32>
    %444 = arith.divf %442, %443 : vector<2x32xf32>
    %445 = vector.extract_strided_slice %10 {offsets = [0, 0], sizes = [2, 32], strides = [1, 1]} : vector<16x32xf32> to vector<2x32xf32>
    %cst_114 = arith.constant dense<0.000000e+00> : vector<2x32xf32>
    %446 = tpu.matmul %413, %16, %cst_114 {dimension_numbers = #tpu.dot_dimension_numbers<[1], [0], [0], [1], [0, 0, 1, 1], [], []>} : vector<2x32xf32>, vector<32x32xf32>, vector<2x32xf32> -> vector<2x32xf32>
    %447 = arith.addf %445, %446 : vector<2x32xf32>
    %448 = arith.negf %447 : vector<2x32xf32>
    %449 = math.exp %448 : vector<2x32xf32>
    %cst_115 = arith.constant 1.000000e+00 : f32
    %450 = vector.broadcast %cst_115 : f32 to vector<2x32xf32>
    %451 = arith.addf %450, %449 : vector<2x32xf32>
    %452 = arith.divf %450, %451 : vector<2x32xf32>
    %453 = vector.extract_strided_slice %11 {offsets = [0, 0], sizes = [2, 32], strides = [1, 1]} : vector<16x32xf32> to vector<2x32xf32>
    %cst_116 = arith.constant dense<0.000000e+00> : vector<2x32xf32>
    %454 = tpu.matmul %413, %17, %cst_116 {dimension_numbers = #tpu.dot_dimension_numbers<[1], [0], [0], [1], [0, 0, 1, 1], [], []>} : vector<2x32xf32>, vector<32x32xf32>, vector<2x32xf32> -> vector<2x32xf32>
    %455 = vector.broadcast %19 : vector<1x32xf32> to vector<2x32xf32>
    %456 = arith.addf %454, %455 : vector<2x32xf32>
    %457 = arith.mulf %444, %456 : vector<2x32xf32>
    %458 = arith.addf %453, %457 : vector<2x32xf32>
    %459 = math.tanh %458 : vector<2x32xf32>
    %cst_117 = arith.constant 1.000000e+00 : f32
    %460 = vector.broadcast %cst_117 : f32 to vector<2x32xf32>
    %461 = arith.subf %460, %429 : vector<2x32xf32>
    %462 = arith.mulf %461, %436 : vector<2x32xf32>
    %463 = arith.mulf %429, %408 : vector<2x32xf32>
    %464 = arith.addf %462, %463 : vector<2x32xf32>
    %cst_118 = arith.constant 1.000000e+00 : f32
    %465 = vector.broadcast %cst_118 : f32 to vector<2x32xf32>
    %466 = arith.subf %465, %452 : vector<2x32xf32>
    %467 = arith.mulf %466, %459 : vector<2x32xf32>
    %468 = arith.mulf %452, %413 : vector<2x32xf32>
    %469 = arith.addf %467, %468 : vector<2x32xf32>
    %c0_119 = arith.constant 0 : index
    %c0_120 = arith.constant 0 : index
    %470 = vector.load %arg12[%c0_119, %c0_120] : memref<1x32xf32, #tpu.memory_space<vmem>>, vector<1x32xf32>
    %471 = vector.broadcast %470 : vector<1x32xf32> to vector<2x32xf32>
    %472 = arith.mulf %464, %471 : vector<2x32xf32>
    %cst_121 = arith.constant dense<0.000000e+00> : vector<2xf32>
    %473 = vector.multi_reduction <add>, %472, %cst_121 [1] : vector<2x32xf32> to vector<2xf32>
    %474 = vector.shape_cast %473 : vector<2xf32> to vector<2x1xf32>
    %c0_122 = arith.constant 0 : index
    %c0_123 = arith.constant 0 : index
    %475 = vector.load %arg13[%c0_122, %c0_123] : memref<1x32xf32, #tpu.memory_space<vmem>>, vector<1x32xf32>
    %476 = vector.broadcast %475 : vector<1x32xf32> to vector<2x32xf32>
    %477 = arith.mulf %469, %476 : vector<2x32xf32>
    %cst_124 = arith.constant dense<0.000000e+00> : vector<2xf32>
    %478 = vector.multi_reduction <add>, %477, %cst_124 [1] : vector<2x32xf32> to vector<2xf32>
    %479 = vector.shape_cast %478 : vector<2xf32> to vector<2x1xf32>
    %480 = arith.addf %474, %479 : vector<2x1xf32>
    %c0_125 = arith.constant 0 : index
    %c0_126 = arith.constant 0 : index
    %481 = vector.load %arg1[%c0_125, %c0_126] : memref<2x1xf32, #tpu.memory_space<vmem>>, vector<2x1xf32>
    %c0_127 = arith.constant 0 : index
    %c0_128 = arith.constant 0 : index
    %482 = vector.load %arg14[%c0_127, %c0_128] : memref<1x1xf32, #tpu.memory_space<vmem>>, vector<1x1xf32>
    %483 = vector.broadcast %482 : vector<1x1xf32> to vector<2x1xf32>
    %484 = arith.mulf %481, %483 : vector<2x1xf32>
    %cst_129 = arith.constant dense<0.000000e+00> : vector<2xf32>
    %485 = vector.multi_reduction <add>, %484, %cst_129 [1] : vector<2x1xf32> to vector<2xf32>
    %486 = vector.shape_cast %485 : vector<2xf32> to vector<2x1xf32>
    %487 = arith.addf %480, %486 : vector<2x1xf32>
    %c0_130 = arith.constant 0 : index
    %c0_131 = arith.constant 0 : index
    %488 = vector.load %arg15[%c0_130, %c0_131] : memref<1x1xf32, #tpu.memory_space<vmem>>, vector<1x1xf32>
    %489 = vector.broadcast %488 : vector<1x1xf32> to vector<2x1xf32>
    %490 = arith.addf %487, %489 : vector<2x1xf32>
    %c0_132 = arith.constant 0 : index
    %c0_133 = arith.constant 0 : index
    %491 = vector.load %arg16[%c0_132, %c0_133] : memref<2x1xf32, #tpu.memory_space<vmem>>, vector<2x1xf32>
    tpu.vector_store %arg16[%c0_132, %c0_133], %490 {strides = array<i32>} : memref<2x1xf32, #tpu.memory_space<vmem>>, vector<2x1xf32>,
    return
  }
}

</mosaic_0001>

<bundles_post_ra>
// kernel: tpu_custom_call.1
= control target key start
LH: loop header
LB: loop body
LE: loop exit
PB: predicated region body
PF: predicated region fallthrough
CT: control target
= control target key end

     0   :  { %v5704_v0 = vmov 0.0|0.0   ;;  %vm5705_vm0 = vmmov 0   ;;  %v5706_v4 = vmov 0.0   ;;  %s5708_s25 = smov 32   ;;  %s5709_s27 = smov 64   ;;  %vm206_vm1 = vcmask 261120   ;;  %s6574_s2 = inlined_call_operand.vmem [shape: f32[128,192], index: 2, kind: input, shape index: {}]   ;;  %s6575_s4 = inlined_call_operand.vmem [shape: f32[32,32], index: 4, kind: input, shape index: {}]   ;;  %s6576_s5 = inlined_call_operand.vmem [shape: f32[32,32], index: 5, kind: input, shape index: {}]   ;;  %s6577_s6 = inlined_call_operand.vmem [shape: f32[32,32], index: 6, kind: input, shape index: {}]   ;;  %s6578_s7 = inlined_call_operand.vmem [shape: f32[32,32], index: 7, kind: input, shape index: {}]   ;;  %s6579_s9 = inlined_call_operand.vmem [shape: f32[32,32], index: 9, kind: input, shape index: {}]   ;;  %s6580_s8 = inlined_call_operand.vmem [shape: f32[32,32], index: 8, kind: input, shape index: {}]   ;;  %s6581_s0 = inlined_call_operand.vmem [shape: f32[16,128], index: 0, kind: input, shape index: {}]   ;;  %s6582_s3 = inlined_call_operand.vmem [shape: f32[1,192], index: 3, kind: input, shape index: {}]   ;;  %s6583_s11 = inlined_call_operand.vmem [shape: f32[1,32], index: 11, kind: input, shape index: {}]   ;;  %s6584_s10 = inlined_call_operand.vmem [shape: f32[1,32], index: 10, kind: input, shape index: {}]   ;;  %s6585_s12 = inlined_call_operand.vmem [shape: f32[1,32], index: 12, kind: input, shape index: {}]   ;;  %s6586_s13 = inlined_call_operand.vmem [shape: f32[1,32], index: 13, kind: input, shape index: {}]   ;;  %s6587_s14 = inlined_call_operand.<no memory space> [shape: f32[1,1], index: 14, kind: input, shape index: {}]   ;;  %s6588_s15 = inlined_call_operand.<no memory space> [shape: f32[1,1], index: 15, kind: input, shape index: {}]   ;;  %s6589_s1 = inlined_call_operand.vmem [shape: f32[2,1], index: 1, kind: input, shape index: {}]   ;;  %s6590_s16 = inlined_call_operand.vmem [shape: f32[2,1], index: 16, kind: output, shape index: {}]  }
   0x1   :  { %6592 = sst [smem:[#allocation4_spill]] %s6574_s2  ;;  %5248 = vmatprep.subr.bf16.mxu1 %v5704_v0  ;;  %v180_v3 = vld [vmem:[%s6575_s4] sm:$0xff]  ;;  %4696 = vmatprep.mubr.msk.f32.mxu1 %vm5705_vm0, %v5706_v4  ;;  %v181_v6 = vld [vmem:[%s6575_s4 + $0x8] sm:$0xff]  ;;  %v182_v13 = vld [vmem:[%s6575_s4 + $0x10] sm:$0xff]  ;;  %vm4320_vm2 = vcmask 261126   ;;  %vm4332_vm3 = vcmask 254976  }
   0x2   :  { %s6593_s23 = sld [smem:[#allocation4_spill]]  ;;  %167 = vmatprep.mubr.f32.mxu0 %v5706_v4  ;;  %v5817_v9 = vpack.c.bf16 %v181_v6, %v180_v3  ;;  %v183_v15 = vld [vmem:[%s6575_s4 + $0x18] sm:$0xff]  ;;  %v184_v22 = vld [vmem:[%s6576_s5] sm:$0xff]  ;;  %v185_v24 = vld [vmem:[%s6576_s5 + $0x8] sm:$0xff]  ;;  %vm4362_vm4 = vcmask 7174  }
   0x3   :  { %v5838_v18 = vpack.c.bf16 %v183_v15, %v182_v13  ;;  %v5866_v29 = vpack.c.bf16 %v185_v24, %v184_v22  ;;  %v186_v31 = vld [vmem:[%s6576_s5 + $0x10] sm:$0xff]  ;;  %v187_v33 = vld [vmem:[%s6576_s5 + $0x18] sm:$0xff]  ;;  %v188_v40 = vld [vmem:[%s6577_s6] sm:$0xff] }
   0x4   :  { %5250 = vmatpush3.bf16.msra.mxu1 %v5817_v9  ;;  %v5889_v38 = vpack.c.bf16 %v187_v33, %v186_v31  ;;  %v189_v42 = vld [vmem:[%s6577_s6 + $0x8] sm:$0xff]  ;;  %v190_v49 = vld [vmem:[%s6577_s6 + $0x10] sm:$0xff]  ;;  %v191_v51 = vld [vmem:[%s6577_s6 + $0x18] sm:$0xff] }
   0x5   :  { %5251 = vmatprep.subr.bf16.mxu1 %v5704_v0  ;;  %v5913_v47 = vpack.c.bf16 %v189_v42, %v188_v40  ;;  %v5936_v56 = vpack.c.bf16 %v191_v51, %v190_v49  ;;  %v192_v58 = vld [vmem:[%s6578_s7] sm:$0xff]  ;;  %v193_v60 = vld [vmem:[%s6578_s7 + $0x8] sm:$0xff]  ;;  %v199_v24 = vld [vmem:[%s6580_s8 + $0x18] sm:$0xff] }
   0x6   :  { %v200_v13 = vld [vmem:[%s6579_s9] sm:$0xff] }
   0x7   :  { %v196_v15 = vld [vmem:[%s6580_s8] sm:$0xff] }
   0x8   :  { %v60_v1 = vld [vmem:[%s6593_s23 + $0x8] sm:$0xff]  ;;  %v62_v2 = vld [vmem:[%s6593_s23 + $0x18] sm:$0xff]  ;;  %v59_v7 = vld [vmem:[%s6593_s23] sm:$0xff]  ;;  %5253 = vmatpush3.bf16.msra.mxu1 %v5838_v18 }
   0x9   :  { %v5216_v5 = vpack.c.bf16 %v62_v2, %v60_v1  ;;  %v61_v8 = vld [vmem:[%s6593_s23 + $0x10] sm:$0xff]  ;;  %v64_v11 = vld [vmem:[%s6593_s23 + $0x28] sm:$0xff]  ;;  %v66_v12 = vld [vmem:[%s6593_s23 + $0x38] sm:$0xff]  ;;  %5254 = vmatprep.subr.bf16.mxu1 %v5704_v0  ;;  %v5960_v2 = vpack.c.bf16 %v193_v60, %v192_v58 }
   0xa   :  { %v5218_v10 = vpack.c.bf16 %v61_v8, %v59_v7  ;;  %v5220_v14 = vpack.c.bf16 %v66_v12, %v64_v11  ;;  %v63_v16 = vld [vmem:[%s6593_s23 + $0x20] sm:$0xff]  ;;  %v65_v17 = vld [vmem:[%s6593_s23 + $0x30] sm:$0xff]  ;;  %v68_v20 = vld [vmem:[%s6593_s23 + $0x48] sm:$0xff] }
   0xb   :  { %5217 = vmatprep.subr.bf16.mxu0 %v5216_v5  ;;  %v5222_v19 = vpack.c.bf16 %v65_v17, %v63_v16  ;;  %v70_v21 = vld [vmem:[%s6593_s23 + $0x58] sm:$0xff]  ;;  %v67_v25 = vld [vmem:[%s6593_s23 + $0x40] sm:$0xff]  ;;  %v69_v26 = vld [vmem:[%s6593_s23 + $0x50] sm:$0xff]  ;;  %4697 = vmatmul.mubr.f32.vlgmr.msra.gmra.mrb[0].mxu1 %v5706_v4 }
   0xc   :  { %5219 = vmatpush1.bf16.msra.mxu0 %v5218_v10  ;;  %v5224_v23 = vpack.c.bf16 %v70_v21, %v68_v20  ;;  %v72_v27 = vld [vmem:[%s6593_s23 + $0x68] sm:$0xff]  ;;  %v74_v28 = vld [vmem:[%s6593_s23 + $0x78] sm:$0xff]  ;;  %v5226_v30 = vpack.c.bf16 %v69_v26, %v67_v25  ;;  %v71_v34 = vld [vmem:[%s6593_s23 + $0x60] sm:$0xff]  ;;  %5256 = vmatpush3.bf16.msra.mxu1 %v5866_v29 }
   0xd   :  { %5221 = vmatprep.subr.bf16.mxu0 %v5220_v14  ;;  %v5228_v32 = vpack.c.bf16 %v74_v28, %v72_v27  ;;  %v73_v35 = vld [vmem:[%s6593_s23 + $0x70] sm:$0xff]  ;;  %v76_v36 = vld [vmem:[%s6593_s23 + $0x88] sm:$0xff]  ;;  %v78_v37 = vld [vmem:[%s6593_s23 + $0x98] sm:$0xff]  ;;  %5257 = vmatprep.subr.bf16.mxu1 %v5704_v0  ;;  %v93_v28 = vlaneseq }
   0xe   :  { %v5230_v39 = vpack.c.bf16 %v73_v35, %v71_v34  ;;  %v5232_v41 = vpack.c.bf16 %v78_v37, %v76_v36  ;;  %v75_v43 = vld [vmem:[%s6593_s23 + $0x80] sm:$0xff]  ;;  %v77_v44 = vld [vmem:[%s6593_s23 + $0x90] sm:$0xff]  ;;  %4707 = vmatprep.mubr.msk.f32.mxu1 %vm5705_vm0, %v5706_v4  ;;  %v80_v45 = vld [vmem:[%s6593_s23 + $0xa8] sm:$0xff] }
   0xf   :  { %v82_v46 = vld [vmem:[%s6593_s23 + $0xb8] sm:$0xff]  ;;  %v5234_v48 = vpack.c.bf16 %v77_v44, %v75_v43  ;;  %v79_v52 = vld [vmem:[%s6593_s23 + $0xa0] sm:$0xff]  ;;  %v81_v53 = vld [vmem:[%s6593_s23 + $0xb0] sm:$0xff] }
  0x10   :  { %5223 = vmatpush1.bf16.msra.mxu0 %v5222_v19  ;;  %5259 = vmatpush3.bf16.msra.mxu1 %v5889_v38  ;;  %v5236_v50 = vpack.c.bf16 %v82_v46, %v80_v45  ;;  %v84_v54 = vld [vmem:[%s6593_s23 + $0xc8] sm:$0xff]  ;;  %v86_v55 = vld [vmem:[%s6593_s23 + $0xd8] sm:$0xff]  ;;  %v5238_v57 = vpack.c.bf16 %v81_v53, %v79_v52  ;;  %v83_v61 = vld [vmem:[%s6593_s23 + $0xc0] sm:$0xff] }
  0x11   :  { %5225 = vmatprep.subr.bf16.mxu0 %v5224_v23  ;;  %5260 = vmatprep.subr.bf16.mxu1 %v5704_v0  ;;  %v5240_v59 = vpack.c.bf16 %v86_v55, %v84_v54  ;;  %v85_v62 = vld [vmem:[%s6593_s23 + $0xd0] sm:$0xff]  ;;  %v88_v63 = vld [vmem:[%s6593_s23 + $0xe8] sm:$0xff]  ;;  %v90_v1 = vld [vmem:[%s6593_s23 + $0xf8] sm:$0xff] }
  0x12   :  { %v5242_v3 = vpack.c.bf16 %v85_v62, %v83_v61  ;;  %v194_v5 = vld [vmem:[%s6578_s7 + $0x10] sm:$0xff]  ;;  %v5244_v6 = vpack.c.bf16 %v90_v1, %v88_v63  ;;  %v195_v7 = vld [vmem:[%s6578_s7 + $0x18] sm:$0xff]  ;;  %v87_v8 = vld [vmem:[%s6593_s23 + $0xe0] sm:$0xff] }
  0x13   :  { %4708 = vmatmul.mubr.f32.vlgmr.msra.gmra.mrb[2].mxu1 %v5706_v4  ;;  %v89_v10 = vld [vmem:[%s6593_s23 + $0xf0] sm:$0xff]  ;;  %v5977_v11 = vpack.c.bf16 %v195_v7, %v194_v5  ;;  %v201_v14 = vld [vmem:[%s6579_s9 + $0x8] sm:$0xff]  ;;  %v57_v17 = vld [vmem:[%s6581_s0] sm:$0xff] }
  0x14   :  { %5227 = vmatpush1.bf16.msra.mxu0 %v5226_v30  ;;  %5262 = vmatpush3.bf16.msra.mxu1 %v5913_v47  ;;  %v5246_v12 = vpack.c.bf16 %v89_v10, %v87_v8  ;;  %v197_v16 = vld [vmem:[%s6580_s8 + $0x8] sm:$0xff]  ;;  %v5998_v19 = vpack.c.bf16 %v201_v14, %v200_v13  ;;  %v202_v20 = vld [vmem:[%s6579_s9 + $0x10] sm:$0xff]  ;;  %v203_v21 = vld [vmem:[%s6579_s9 + $0x18] sm:$0xff]  ;;  %v94_v30 = vshrl.u32 %v93_v28, 7 }
  0x15   :  { %5229 = vmatprep.subr.bf16.mxu0 %v5228_v32  ;;  %5263 = vmatprep.subr.bf16.mxu1 %v5704_v0  ;;  %v6008_v22 = vpack.c.bf16 %v197_v16, %v196_v15  ;;  %v198_v23 = vld [vmem:[%s6580_s8 + $0x10] sm:$0xff]  ;;  %v6018_v25 = vpack.c.bf16 %v203_v21, %v202_v20  ;;  %v58_v26 = vld [vmem:[%s6581_s0 + $0x8] sm:$0xff]  ;;  %v91_v31 = vld [vmem:[%s6582_s3] sm:$0x3]  ;;  %s5707_s3 = smov 96  }
  0x16   :  { %4718 = vmatprep.mubr.msk.f32.mxu1 %vm5705_vm0, %v5706_v4  ;;  %v6028_v27 = vpack.c.bf16 %v199_v24, %v198_v23  ;;  %v99_v32 = vsub.s32 1, %v94_v30 }
  0x18   :  { %5231 = vmatpush1.bf16.msra.mxu0 %v5230_v39  ;;  %5265 = vmatpush3.bf16.msra.mxu1 %v5936_v56  ;;  %v100_v33 = vrot.slane %v91_v31, %v99_v32 }
  0x19   :  { %5233 = vmatprep.subr.bf16.mxu0 %v5232_v41  ;;  %5266 = vmatprep.subr.bf16.mxu1 %v5704_v0  ;;  %v95_v41 = vsub.s32 0, %v94_v30 }
  0x1b   :  { %4719 = vmatmul.mubr.f32.vlgmr.msra.gmra.mrb[4].mxu1 %v5706_v4  ;;  %v96_v42 = vrot.slane %v91_v31, %v95_v41 }
  0x1c   :  { %5235 = vmatpush1.bf16.msra.mxu0 %v5234_v48  ;;  %5268 = vmatpush3.bf16.msra.mxu1 %v5960_v2 }
  0x1d   :  { %5237 = vmatprep.subr.bf16.mxu0 %v5236_v50  ;;  %5269 = vmatprep.subr.bf16.mxu1 %v5704_v0 }
  0x1e   :  { %4729 = vmatprep.mubr.msk.f32.mxu1 %vm5705_vm0, %v5706_v4 }
  0x20   :  { %5239 = vmatpush1.bf16.msra.mxu0 %v5238_v57  ;;  %5271 = vmatpush3.bf16.msra.mxu1 %v5977_v11  ;;  %v6065_v57 = vld [vmem:[%s6583_s11] ss:$0 sm:$0xff] }
  0x21   :  { %5241 = vmatprep.subr.bf16.mxu0 %v5240_v59  ;;  %5278 = vmatprep.subr.bf16.mxu1 %v5704_v0 }
  0x23   :  { %4730 = vmatmul.mubr.f32.vlgmr.msra.gmra.mrb[6].mxu1 %v5706_v4 }
  0x24   :  { %5243 = vmatpush1.bf16.msra.mxu0 %v5242_v3  ;;  %5280 = vmatpush3.bf16.msra.mxu1 %v5998_v19 }
  0x25   :  { %5245 = vmatprep.subr.bf16.mxu0 %v5244_v6  ;;  %4751 = vmatprep.mubr.msk.f32.mxu1 %vm5705_vm0, %v5706_v4  ;;  %v6075_v6 = vld [vmem:[%s6584_s10] ss:$0 sm:$0xff] }
  0x26   :  { %5281 = vmatprep.subr.bf16.mxu1 %v5704_v0 }
  0x28   :  { %5247 = vmatpush1.bf16.msra.mxu0 %v5246_v12  ;;  %5283 = vmatpush3.bf16.msra.mxu1 %v6018_v25 }
  0x29   :  { %5272 = vmatprep.subr.bf16.mxu0 %v5704_v0  ;;  %5290 = vmatprep.subr.bf16.mxu1 %v5704_v0 }
  0x2b   :  { %168 = vmatmul.mubr.f32.vlgmr.msra.gmra.mrb[0].mxu0 %v57_v17  ;;  %4752 = vmatmul.mubr.f32.vlgmr.msra.gmra.mrb[8].mxu1 %v5706_v4 }
  0x2c   :  { %173 = vmatprep.mubr.f32.mxu0 %v5706_v4  ;;  %5274 = vmatpush3.bf16.msra.mxu0 %v6008_v22 }
  0x2d   :  { %5275 = vmatprep.subr.bf16.mxu0 %v5704_v0  ;;  %5292 = vmatpush3.bf16.msra.mxu1 %v5866_v29 }
  0x2e   :  { %4773 = vmatprep.mubr.msk.f32.mxu1 %vm5705_vm0, %v5706_v4  ;;  %5293 = vmatprep.subr.bf16.mxu1 %v5704_v0 }
  0x2f   :  { %174 = vmatmul.mubr.f32.gmra.mrb[2].mxu0 %v58_v26 }
  0x30   :  { %4740 = vmatprep.mubr.msk.f32.mxu0 %vm5705_vm0, %v5706_v4  ;;  %5277 = vmatpush3.bf16.msra.mxu0 %v6028_v27 }
  0x31   :  { %5284 = vmatprep.subr.bf16.mxu0 %v5704_v0  ;;  %5295 = vmatpush3.bf16.msra.mxu1 %v5889_v38 }
  0x32   :  { %5302 = vmatprep.subr.bf16.mxu1 %v5704_v0 }
  0x33   :  { %4741 = vmatmul.mubr.f32.vlgmr.msra.gmra.mrb[4].mxu0 %v5706_v4 }
  0x34   :  { %5286 = vmatpush3.bf16.msra.mxu0 %v5817_v9  ;;  %4762 = vmatprep.mubr.msk.f32.mxu0 %vm5705_vm0, %v5706_v4 }
  0x35   :  { %5287 = vmatprep.subr.bf16.mxu0 %v5704_v0 }
  0x38   :  { %5289 = vmatpush3.bf16.msra.mxu0 %v5838_v18 }
  0x39   :  { %5296 = vmatprep.subr.bf16.mxu0 %v5704_v0 }
  0xde   :  { %v276_v34 = vpop.f32.mrb[0].mxu1 }
  0xdf   :  { %v4698_v35 = vpop.f32.mrb[1].mxu1 }
  0xe6   :  { %v353_v36 = vpop.f32.mrb[2].mxu1 }
  0xe7   :  { %v4709_v37 = vpop.f32.mrb[3].mxu1 }
  0xee   :  { %v440_v39 = vpop.f32.mrb[4].mxu1 }
  0xef   :  { %v4720_v40 = vpop.f32.mrb[5].mxu1  ;;  %v441_v7 = vadd.f32 %v6075_v6, %v440_v39 }
  0xf6   :  { %v517_v43 = vpop.f32.mrb[6].mxu1 }
  0xf7   :  { %v522_v45 = vrot.slane %v517_v43, 2  ;;  %v4731_v49 = vpop.f32.mrb[7].mxu1 }
  0xf9   :  { %523 = vrot.lane.b32.xlu0 %v522_v45, %s5707_s3 }
  0xfe   :  { %v169_v44 = vpop.f32.mrb[0].mxu0  ;;  %v685_v59 = vpop.f32.mrb[8].mxu1 }
  0xff   :  { %v6054_v46 = vadd.f32 %v169_v44, %v96_v42  ;;  %v171_v48 = vpop.f32.mrb[1].mxu0  ;;  %v686_v60 = vadd.f32 %v6065_v57, %v685_v59  ;;  %v4753_v61 = vpop.f32.mrb[9].mxu1 }
 0x100   :  { %v6056_v50 = vadd.f32 %v171_v48, %v100_v33 }
 0x101   :  { %v280_v51 = vadd.f32 %v276_v34, %v6054_v46  ;;  %v690_v63 = vrot.slane %v686_v60, 2 }
 0x102   :  { %v175_v52 = vpop.f32.mrb[2].mxu0 }
 0x103   :  { %v4368_v53 = vmul.f32 -1.442695, %v280_v51  ;;  %v6060_v54 = vadd.f32 %v175_v52, %v96_v42  ;;  %v177_v55 = vpop.f32.mrb[3].mxu0  ;;  %691 = vrot.lane.b32.xlu1 %v690_v63, %s5707_s3 }
 0x104   :  { %v6067_v58 = vadd.f32 %v177_v55, %v100_v33 }
 0x105   :  { %5542 = vpow2.f32 %v4368_v53 }
 0x106   :  { %v599_v62 = vpop.f32.mrb[4].mxu0 }
 0x107   :  { %v4742_v1 = vpop.f32.mrb[5].mxu0  ;;  %358 = vrot.lane.b32.xlu1 %v353_v36, %s5708_s25  ;;  %v604_v44 = vrot.slane %v599_v62, 2 }
 0x109   :  { %v606_v45 = vadd.f32 %v604_v44, %v6067_v58 }
 0x10b   :  { %v4372_v48 = vmul.f32 -1.442695, %v606_v45 }
 0x10f   :  { %v5543_v3 = vpop.eup %5542 }
 0x110   :  { %v284_v5 = vadd.f32 1.0, %v5543_v3 }
 0x112   :  { %5544 = vrcp.f32 %v284_v5 }
 0x11c   :  { %v5545_v8 = vpop.eup %5544 }
 0x11d   :  { %v444_v10 = vmul.f32 %v5545_v8, %v441_v7 }
 0x11f   :  { %446 = vrot.lane.b32.xlu0 %v444_v10, %s5709_s27 }
 0x16b   :  { %v524_v12 = vpop.permute.xlu0 %523 }
 0x16c   :  { %v526_v13 = vadd.f32 %v524_v12, %v6060_v54 }
 0x16e   :  { %v4371_v14 = vmul.f32 -1.442695, %v526_v13 }
 0x170   :  { %5546 = vpow2.f32 %v4371_v14 }
 0x175   :  { %v692_v20 = vpop.permute.xlu1 %691 }
 0x179   :  { %v359_v28 = vpop.permute.xlu1 %358 }
 0x17a   :  { %v5547_v15 = vpop.eup %5546  ;;  %v361_v30 = vadd.f32 %v359_v28, %v6054_v46 }
 0x17b   :  { %v530_v16 = vadd.f32 1.0, %v5547_v15 }
 0x17c   :  { %v4369_v31 = vmul.f32 -1.442695, %v361_v30 }
 0x17d   :  { %5548 = vrcp.f32 %v530_v16 }
 0x187   :  { %v5549_v17 = vpop.eup %5548 }
 0x188   :  { %v694_v21 = vmul.f32 %v5549_v17, %v692_v20 }
 0x18a   :  { %696 = vrot.lane.b32.xlu0 %v694_v21, %s5709_s27 }
 0x191   :  { %v447_v23 = vpop.permute.xlu0 %446 }
 0x192   :  { %v449_v24 = vadd.f32 %v447_v23, %v6054_v46 }
 0x194   :  { %5550 = vtanh.f32 %v449_v24 }
 0x195   :  { %5552 = vpow2.f32 %v4369_v31 }
 0x19e   :  { %v5551_v26 = vpop.eup %5550 }
 0x19f   :  { %703 = vrot.lane.b32.xlu1 %v5551_v26, %s5707_s3  ;;  %v5553_v32 = vpop.eup %5552 }
 0x1a0   :  { %v365_v33 = vadd.f32 1.0, %v5553_v32 }
 0x1a2   :  { %5554 = vrcp.f32 %v365_v33 }
 0x1ac   :  { %v5555_v36 = vpop.eup %5554 }
 0x1ad   :  { %v701_v37 = vsub.f32 1.0, %v5555_v36  ;;  %v707_v41 = vmul.f32 0.0, %v5555_v36 }
 0x1fc   :  { %v697_v34 = vpop.permute.xlu0 %696 }
 0x1fd   :  { %v699_v35 = vadd.f32 %v697_v34, %v6067_v58 }
 0x1ff   :  { %5556 = vtanh.f32 %v699_v35 }
 0x200   :  { %5558 = vpow2.f32 %v4372_v48 }
 0x209   :  { %v5557_v39 = vpop.eup %5556 }
 0x20a   :  { %711 = vrot.lane.b32.xlu1 %v5557_v39, %s5707_s3  ;;  %v5559_v49 = vpop.eup %5558 }
 0x20b   :  { %v610_v51 = vadd.f32 1.0, %v5559_v49 }
 0x20d   :  { %5560 = vrcp.f32 %v610_v51 }
 0x211   :  { %v704_v40 = vpop.permute.xlu1 %703 }
 0x212   :  { %v706_v42 = vmul.f32 %v704_v40, %v701_v37 }
 0x214   :  { %v6086_v43 = vadd.f32 %v707_v41, %v706_v42 }
 0x216   :  { %718 = vrot.lane.b32.xlu0 %v6086_v43, %s5707_s3 }
 0x217   :  { %v5561_v52 = vpop.eup %5560 }
 0x218   :  { %v709_v55 = vsub.f32 1.0, %v5561_v52  ;;  %v715_v61 = vmul.f32 0.0, %v5561_v52 }
 0x27c   :  { %v712_v53 = vpop.permute.xlu1 %711 }
 0x27d   :  { %v714_v59 = vmul.f32 %v712_v53, %v709_v55 }
 0x27f   :  { %v6095_v62 = vadd.f32 %v715_v61, %v714_v59 }
 0x281   :  { %v965_v63 = vrot.slane %v6095_v62, 6  ;;  %v1228_v44 = vrot.slane %v6095_v62, 2 }
 0x288   :  { %v719_v60 = vpop.permute.xlu0 %718 }
 0x289   :  { %4763 = vmatmul.mubr.msk.f32.vlgmr.msra.gmra.mrb[6].mxu0 %vm206_vm1, %v719_v60  ;;  %4774 = vmatmul.mubr.msk.f32.vlgmr.msra.gmra.mrb[10].mxu1 %vm206_vm1, %v719_v60 }
 0x28a   :  { %5298 = vmatpush3.bf16.msra.mxu0 %v5913_v47  ;;  %5304 = vmatpush3.bf16.msra.mxu1 %v5960_v2 }
 0x28b   :  { %5299 = vmatprep.subr.bf16.mxu0 %v5704_v0  ;;  %5305 = vmatprep.subr.bf16.mxu1 %v5704_v0 }
 0x28c   :  { %4784 = vmatprep.mubr.msk.f32.mxu0 %vm5705_vm0, %v5706_v4  ;;  %4795 = vmatprep.mubr.msk.f32.mxu1 %vm5705_vm0, %v5706_v4 }
 0x28e   :  { %5301 = vmatpush3.bf16.msra.mxu0 %v5936_v56  ;;  %5307 = vmatpush3.bf16.msra.mxu1 %v5977_v11 }
 0x28f   :  { %5308 = vmatprep.subr.bf16.mxu0 %v5704_v0  ;;  %5314 = vmatprep.subr.bf16.mxu1 %v5704_v0 }
 0x291   :  { %4785 = vmatmul.mubr.msk.f32.vlgmr.msra.gmra.mrb[8].mxu0 %vm206_vm1, %v719_v60  ;;  %4796 = vmatmul.mubr.msk.f32.vlgmr.msra.gmra.mrb[12].mxu1 %vm206_vm1, %v965_v63 }
 0x292   :  { %5310 = vmatpush3.bf16.msra.mxu0 %v6008_v22  ;;  %5316 = vmatpush3.bf16.msra.mxu1 %v5998_v19 }
 0x293   :  { %5311 = vmatprep.subr.bf16.mxu0 %v5704_v0  ;;  %5317 = vmatprep.subr.bf16.mxu1 %v5704_v0 }
 0x294   :  { %4806 = vmatprep.mubr.msk.f32.mxu0 %vm5705_vm0, %v5706_v4  ;;  %4817 = vmatprep.mubr.msk.f32.mxu1 %vm5705_vm0, %v5706_v4 }
 0x296   :  { %5313 = vmatpush3.bf16.msra.mxu0 %v6028_v27  ;;  %5319 = vmatpush3.bf16.msra.mxu1 %v6018_v25 }
 0x297   :  { %5320 = vmatprep.subr.bf16.mxu0 %v5704_v0  ;;  %5326 = vmatprep.subr.bf16.mxu1 %v5704_v0 }
 0x299   :  { %4807 = vmatmul.mubr.msk.f32.vlgmr.msra.gmra.mrb[10].mxu0 %vm206_vm1, %v965_v63  ;;  %4818 = vmatmul.mubr.msk.f32.vlgmr.msra.gmra.mrb[14].mxu1 %vm206_vm1, %v965_v63 }
 0x29a   :  { %5322 = vmatpush3.bf16.msra.mxu0 %v5817_v9  ;;  %5328 = vmatpush3.bf16.msra.mxu1 %v5866_v29 }
 0x29b   :  { %5323 = vmatprep.subr.bf16.mxu0 %v5704_v0  ;;  %5329 = vmatprep.subr.bf16.mxu1 %v5704_v0 }
 0x29c   :  { %4828 = vmatprep.mubr.msk.f32.mxu0 %vm5705_vm0, %v5706_v4  ;;  %4839 = vmatprep.mubr.msk.f32.mxu1 %vm5705_vm0, %v5706_v4 }
 0x29e   :  { %5325 = vmatpush3.bf16.msra.mxu0 %v5838_v18  ;;  %5331 = vmatpush3.bf16.msra.mxu1 %v5889_v38 }
 0x29f   :  { %5332 = vmatprep.subr.bf16.mxu0 %v5704_v0  ;;  %5338 = vmatprep.subr.bf16.mxu1 %v5704_v0 }
 0x35c   :  { %v788_v1 = vpop.f32.mrb[6].mxu0  ;;  %v868_v3 = vpop.f32.mrb[10].mxu1 }
 0x35d   :  { %v793_v5 = vrot.slane %v788_v1, 6  ;;  %v4764_v7 = vpop.f32.mrb[7].mxu0  ;;  %v4775_v8 = vpop.f32.mrb[11].mxu1  ;;  %v873_v42 = vrot.slane %v868_v3, 6 }
 0x35f   :  { %v795_v10 = vadd.f32 %v793_v5, %v6054_v46 }
 0x361   :  { %v4375_v12 = vmul.f32 -1.442695, %v795_v10 }
 0x363   :  { %5562 = vpow2.f32 %v4375_v12 }
 0x364   :  { %v950_v13 = vpop.f32.mrb[8].mxu0  ;;  %v1034_v14 = vpop.f32.mrb[12].mxu1 }
 0x365   :  { %v1039_v15 = vrot.slane %v1034_v14, 4  ;;  %v4786_v16 = vpop.f32.mrb[9].mxu0  ;;  %v4797_v17 = vpop.f32.mrb[13].mxu1  ;;  %v951_v35 = vadd.f32 %v6075_v6, %v950_v13 }
 0x367   :  { %1040 = vrot.lane.b32.xlu0 %v1039_v15, %s5707_s3  ;;  %v955_v36 = vrot.slane %v951_v35, 6  ;;  %v1218_v15 = vrot.slane %v6086_v43, 6 }
 0x36c   :  { %v1116_v20 = vpop.f32.mrb[10].mxu0  ;;  %v1196_v21 = vpop.f32.mrb[14].mxu1 }
 0x36d   :  { %v5563_v23 = vpop.eup %5562  ;;  %v1121_v24 = vrot.slane %v1116_v20, 4  ;;  %v1197_v26 = vadd.f32 %v6065_v57, %v1196_v21  ;;  %v4808_v28 = vpop.f32.mrb[11].mxu0 }
 0x36e   :  { %v4819_v30 = vpop.f32.mrb[15].mxu1  ;;  %v799_v31 = vadd.f32 1.0, %v5563_v23 }
 0x36f   :  { %v1123_v32 = vadd.f32 %v1121_v24, %v6067_v58  ;;  %v1201_v33 = vrot.slane %v1197_v26, 4 }
 0x370   :  { %5564 = vrcp.f32 %v799_v31 }
 0x371   :  { %v4382_v34 = vmul.f32 -1.442695, %v1123_v32  ;;  %1202 = vrot.lane.b32.xlu0 %v1201_v33, %s5707_s3 }
 0x373   :  { %5566 = vpow2.f32 %v4382_v34 }
 0x37a   :  { %v5565_v37 = vpop.eup %5564 }
 0x37b   :  { %v957_v39 = vmul.f32 %v5565_v37, %v955_v36 }
 0x37d   :  { %v5567_v40 = vpop.eup %5566  ;;  %959 = vrot.lane.b32.xlu1 %v957_v39, %s5709_s27 }
 0x37e   :  { %v1127_v41 = vadd.f32 1.0, %v5567_v40 }
 0x380   :  { %5568 = vrcp.f32 %v1127_v41 }
 0x381   :  { %874 = vrot.lane.b32.xlu1 %v873_v42, %s5708_s25 }
 0x38a   :  { %v5569_v45 = vpop.eup %5568 }
 0x38b   :  { %v1230_v48 = vmul.f32 %v5569_v45, %v1228_v44  ;;  %v1222_v30 = vsub.f32 1.0, %v5569_v45 }
 0x3d9   :  { %v1041_v49 = vpop.permute.xlu0 %1040 }
 0x3da   :  { %v1043_v51 = vadd.f32 %v1041_v49, %v6060_v54 }
 0x3dc   :  { %v4380_v52 = vmul.f32 -1.442695, %v1043_v51 }
 0x3de   :  { %5570 = vpow2.f32 %v4380_v52 }
 0x3e3   :  { %v1203_v63 = vpop.permute.xlu0 %1202 }
 0x3e8   :  { %v5571_v53 = vpop.eup %5570 }
 0x3e9   :  { %v1047_v55 = vadd.f32 1.0, %v5571_v53 }
 0x3eb   :  { %5572 = vrcp.f32 %v1047_v55 }
 0x3ef   :  { %v960_v59 = vpop.permute.xlu1 %959 }
 0x3f0   :  { %v962_v60 = vadd.f32 %v960_v59, %v6054_v46 }
 0x3f2   :  { %5574 = vtanh.f32 %v962_v60 }
 0x3f3   :  { %v875_v3 = vpop.permute.xlu1 %874 }
 0x3f4   :  { %v877_v5 = vadd.f32 %v875_v3, %v6054_v46 }
 0x3f5   :  { %v5573_v61 = vpop.eup %5572 }
 0x3f6   :  { %v1205_v1 = vmul.f32 %v5573_v61, %v1203_v63  ;;  %v4377_v7 = vmul.f32 -1.442695, %v877_v5 }
 0x3f8   :  { %1207 = vrot.lane.b32.xlu0 %v1205_v1, %s5709_s27  ;;  %5576 = vpow2.f32 %v4377_v7 }
 0x3fc   :  { %v5575_v62 = vpop.eup %5574 }
 0x3fd   :  { %1214 = vrot.lane.b32.xlu1 %v5575_v62, %s5707_s3 }
 0x402   :  { %v5577_v8 = vpop.eup %5576 }
 0x403   :  { %v881_v10 = vadd.f32 1.0, %v5577_v8 }
 0x405   :  { %5578 = vrcp.f32 %v881_v10 }
 0x40f   :  { %v5579_v13 = vpop.eup %5578 }
 0x410   :  { %v1212_v16 = vsub.f32 1.0, %v5579_v13  ;;  %v1220_v20 = vmul.f32 %v5579_v13, %v1218_v15 }
 0x46a   :  { %v1208_v12 = vpop.permute.xlu0 %1207 }
 0x46b   :  { %v1210_v14 = vadd.f32 %v1208_v12, %v6067_v58 }
 0x46d   :  { %5580 = vtanh.f32 %v1210_v14 }
 0x46f   :  { %v1215_v17 = vpop.permute.xlu1 %1214 }
 0x470   :  { %v1217_v21 = vmul.f32 %v1215_v17, %v1212_v16 }
 0x472   :  { %v6152_v23 = vadd.f32 %v1220_v20, %v1217_v21 }
 0x474   :  { %v1233_v24 = vrot.slane %v6152_v23, 2 }
 0x476   :  { %1234 = vrot.lane.b32.xlu0 %v1233_v24, %s5707_s3 }
 0x477   :  { %v5581_v26 = vpop.eup %5580 }
 0x478   :  { %1224 = vrot.lane.b32.xlu1 %v5581_v26, %s5707_s3 }
 0x4e8   :  { %v1235_v28 = vpop.permute.xlu0 %1234 }
 0x4e9   :  { %4829 = vmatmul.mubr.msk.f32.vlgmr.msra.gmra.mrb[12].mxu0 %vm206_vm1, %v1235_v28  ;;  %4840 = vmatmul.mubr.msk.f32.vlgmr.msra.gmra.mrb[16].mxu1 %vm206_vm1, %v1235_v28 }
 0x4ea   :  { %5334 = vmatpush3.bf16.msra.mxu0 %v5913_v47  ;;  %5340 = vmatpush3.bf16.msra.mxu1 %v5960_v2  ;;  %v1225_v43 = vpop.permute.xlu1 %1224 }
 0x4eb   :  { %v1227_v31 = vmul.f32 %v1225_v43, %v1222_v30  ;;  %5335 = vmatprep.subr.bf16.mxu0 %v5704_v0  ;;  %5341 = vmatprep.subr.bf16.mxu1 %v5704_v0 }
 0x4ec   :  { %4850 = vmatprep.mubr.msk.f32.mxu0 %vm5705_vm0, %v5706_v4  ;;  %4861 = vmatprep.mubr.msk.f32.mxu1 %vm5705_vm0, %v5706_v4 }
 0x4ed   :  { %v6167_v32 = vadd.f32 %v1230_v48, %v1227_v31 }
 0x4ee   :  { %5337 = vmatpush3.bf16.msra.mxu0 %v5936_v56  ;;  %5343 = vmatpush3.bf16.msra.mxu1 %v5977_v11 }
 0x4ef   :  { %v1481_v33 = vrot.slane %v6167_v32, 4  ;;  %5344 = vmatprep.subr.bf16.mxu0 %v5704_v0  ;;  %5350 = vmatprep.subr.bf16.mxu1 %v5704_v0  ;;  %v1744_v15 = vrot.slane %v6167_v32, 2 }
 0x4f1   :  { %4851 = vmatmul.mubr.msk.f32.vlgmr.msra.gmra.mrb[14].mxu0 %vm206_vm1, %v1235_v28  ;;  %4862 = vmatmul.mubr.msk.f32.vlgmr.msra.gmra.mrb[18].mxu1 %vm206_vm1, %v1481_v33 }
 0x4f2   :  { %5346 = vmatpush3.bf16.msra.mxu0 %v6008_v22  ;;  %5352 = vmatpush3.bf16.msra.mxu1 %v5998_v19 }
 0x4f3   :  { %5347 = vmatprep.subr.bf16.mxu0 %v5704_v0  ;;  %5353 = vmatprep.subr.bf16.mxu1 %v5704_v0 }
 0x4f4   :  { %4872 = vmatprep.mubr.msk.f32.mxu0 %vm5705_vm0, %v5706_v4  ;;  %4883 = vmatprep.mubr.msk.f32.mxu1 %vm5705_vm0, %v5706_v4 }
 0x4f6   :  { %5349 = vmatpush3.bf16.msra.mxu0 %v6028_v27  ;;  %5355 = vmatpush3.bf16.msra.mxu1 %v6018_v25 }
 0x4f7   :  { %5356 = vmatprep.subr.bf16.mxu0 %v5704_v0  ;;  %5362 = vmatprep.subr.bf16.mxu1 %v5704_v0 }
 0x4f9   :  { %4873 = vmatmul.mubr.msk.f32.vlgmr.msra.gmra.mrb[16].mxu0 %vm206_vm1, %v1481_v33  ;;  %4884 = vmatmul.mubr.msk.f32.vlgmr.msra.gmra.mrb[20].mxu1 %vm206_vm1, %v1481_v33 }
 0x4fa   :  { %5358 = vmatpush3.bf16.msra.mxu0 %v5817_v9  ;;  %5364 = vmatpush3.bf16.msra.mxu1 %v5866_v29 }
 0x4fb   :  { %5359 = vmatprep.subr.bf16.mxu0 %v5704_v0  ;;  %5365 = vmatprep.subr.bf16.mxu1 %v5704_v0 }
 0x4fc   :  { %4894 = vmatprep.mubr.msk.f32.mxu0 %vm5705_vm0, %v5706_v4  ;;  %4905 = vmatprep.mubr.msk.f32.mxu1 %vm5705_vm0, %v5706_v4 }
 0x4fe   :  { %5361 = vmatpush3.bf16.msra.mxu0 %v5838_v18  ;;  %5367 = vmatpush3.bf16.msra.mxu1 %v5889_v38 }
 0x4ff   :  { %5368 = vmatprep.subr.bf16.mxu0 %v5704_v0  ;;  %5374 = vmatprep.subr.bf16.mxu1 %v5704_v0 }
 0x5bc   :  { %v1304_v34 = vpop.f32.mrb[12].mxu0  ;;  %v1384_v35 = vpop.f32.mrb[16].mxu1 }
 0x5bd   :  { %v1309_v36 = vrot.slane %v1304_v34, 4  ;;  %v4830_v37 = vpop.f32.mrb[13].mxu0  ;;  %v4841_v39 = vpop.f32.mrb[17].mxu1  ;;  %v1389_v14 = vrot.slane %v1384_v35, 4 }
 0x5bf   :  { %v1311_v40 = vadd.f32 %v1309_v36, %v6054_v46 }
 0x5c1   :  { %v4385_v41 = vmul.f32 -1.442695, %v1311_v40 }
 0x5c3   :  { %5582 = vpow2.f32 %v4385_v41 }
 0x5c4   :  { %v1466_v42 = vpop.f32.mrb[14].mxu0  ;;  %v1550_v44 = vpop.f32.mrb[18].mxu1 }
 0x5c5   :  { %v1555_v45 = vrot.slane %v1550_v44, 6  ;;  %v4852_v48 = vpop.f32.mrb[15].mxu0  ;;  %v4863_v49 = vpop.f32.mrb[19].mxu1  ;;  %v1467_v5 = vadd.f32 %v6075_v6, %v1466_v42 }
 0x5c7   :  { %1556 = vrot.lane.b32.xlu0 %v1555_v45, %s5707_s3  ;;  %v1471_v7 = vrot.slane %v1467_v5, 4  ;;  %v1734_v45 = vrot.slane %v6152_v23, 6 }
 0x5cc   :  { %v1632_v51 = vpop.f32.mrb[16].mxu0  ;;  %v1712_v52 = vpop.f32.mrb[20].mxu1 }
 0x5cd   :  { %v5583_v53 = vpop.eup %5582  ;;  %v1637_v55 = vrot.slane %v1632_v51, 6  ;;  %v1713_v59 = vadd.f32 %v6065_v57, %v1712_v52  ;;  %v4874_v60 = vpop.f32.mrb[17].mxu0 }
 0x5ce   :  { %v4885_v61 = vpop.f32.mrb[21].mxu1  ;;  %v1315_v63 = vadd.f32 1.0, %v5583_v53 }
 0x5cf   :  { %v1639_v1 = vadd.f32 %v1637_v55, %v6067_v58  ;;  %v1717_v62 = vrot.slane %v1713_v59, 6 }
 0x5d0   :  { %5584 = vrcp.f32 %v1315_v63 }
 0x5d1   :  { %v4392_v3 = vmul.f32 -1.442695, %v1639_v1  ;;  %1718 = vrot.lane.b32.xlu0 %v1717_v62, %s5707_s3 }
 0x5d3   :  { %5586 = vpow2.f32 %v4392_v3 }
 0x5da   :  { %v5585_v8 = vpop.eup %5584 }
 0x5db   :  { %v1473_v10 = vmul.f32 %v5585_v8, %v1471_v7 }
 0x5dd   :  { %v5587_v12 = vpop.eup %5586  ;;  %1475 = vrot.lane.b32.xlu1 %v1473_v10, %s5709_s27 }
 0x5de   :  { %v1643_v13 = vadd.f32 1.0, %v5587_v12 }
 0x5e0   :  { %5588 = vrcp.f32 %v1643_v13 }
 0x5e1   :  { %1390 = vrot.lane.b32.xlu1 %v1389_v14, %s5708_s25 }
 0x5ea   :  { %v5589_v16 = vpop.eup %5588 }
 0x5eb   :  { %v1746_v17 = vmul.f32 %v5589_v16, %v1744_v15  ;;  %v1738_v61 = vsub.f32 1.0, %v5589_v16 }
 0x639   :  { %v1557_v20 = vpop.permute.xlu0 %1556 }
 0x63a   :  { %v1559_v21 = vadd.f32 %v1557_v20, %v6060_v54 }
 0x63c   :  { %v4390_v24 = vmul.f32 -1.442695, %v1559_v21 }
 0x63e   :  { %5590 = vpow2.f32 %v4390_v24 }
 0x643   :  { %v1719_v33 = vpop.permute.xlu0 %1718 }
 0x648   :  { %v5591_v26 = vpop.eup %5590 }
 0x649   :  { %v1563_v28 = vadd.f32 1.0, %v5591_v26 }
 0x64b   :  { %5592 = vrcp.f32 %v1563_v28 }
 0x64f   :  { %v1476_v30 = vpop.permute.xlu1 %1475 }
 0x650   :  { %v1478_v43 = vadd.f32 %v1476_v30, %v6054_v46 }
 0x652   :  { %5594 = vtanh.f32 %v1478_v43 }
 0x653   :  { %v1391_v35 = vpop.permute.xlu1 %1390 }
 0x654   :  { %v1393_v36 = vadd.f32 %v1391_v35, %v6054_v46 }
 0x655   :  { %v5593_v31 = vpop.eup %5592 }
 0x656   :  { %v1721_v34 = vmul.f32 %v5593_v31, %v1719_v33  ;;  %v4387_v37 = vmul.f32 -1.442695, %v1393_v36 }
 0x658   :  { %1723 = vrot.lane.b32.xlu0 %v1721_v34, %s5709_s27  ;;  %5596 = vpow2.f32 %v4387_v37 }
 0x65c   :  { %v5595_v32 = vpop.eup %5594 }
 0x65d   :  { %1730 = vrot.lane.b32.xlu1 %v5595_v32, %s5707_s3 }
 0x662   :  { %v5597_v39 = vpop.eup %5596 }
 0x663   :  { %v1397_v40 = vadd.f32 1.0, %v5597_v39 }
 0x665   :  { %5598 = vrcp.f32 %v1397_v40 }
 0x66f   :  { %v5599_v42 = vpop.eup %5598 }
 0x670   :  { %v1728_v48 = vsub.f32 1.0, %v5599_v42  ;;  %v1736_v51 = vmul.f32 %v5599_v42, %v1734_v45 }
 0x6ca   :  { %v1724_v41 = vpop.permute.xlu0 %1723 }
 0x6cb   :  { %v1726_v44 = vadd.f32 %v1724_v41, %v6067_v58 }
 0x6cd   :  { %5600 = vtanh.f32 %v1726_v44 }
 0x6cf   :  { %v1731_v49 = vpop.permute.xlu1 %1730 }
 0x6d0   :  { %v1733_v52 = vmul.f32 %v1731_v49, %v1728_v48 }
 0x6d2   :  { %v6218_v53 = vadd.f32 %v1736_v51, %v1733_v52 }
 0x6d4   :  { %v1749_v55 = vrot.slane %v6218_v53, 4 }
 0x6d6   :  { %1750 = vrot.lane.b32.xlu0 %v1749_v55, %s5707_s3 }
 0x6d7   :  { %v5601_v59 = vpop.eup %5600 }
 0x6d8   :  { %1740 = vrot.lane.b32.xlu1 %v5601_v59, %s5707_s3 }
 0x748   :  { %v1751_v60 = vpop.permute.xlu0 %1750 }
 0x749   :  { %4895 = vmatmul.mubr.msk.f32.vlgmr.msra.gmra.mrb[18].mxu0 %vm206_vm1, %v1751_v60  ;;  %4906 = vmatmul.mubr.msk.f32.vlgmr.msra.gmra.mrb[22].mxu1 %vm206_vm1, %v1751_v60 }
 0x74a   :  { %5370 = vmatpush3.bf16.msra.mxu0 %v5913_v47  ;;  %5376 = vmatpush3.bf16.msra.mxu1 %v5960_v2  ;;  %v1741_v23 = vpop.permute.xlu1 %1740 }
 0x74b   :  { %v1743_v63 = vmul.f32 %v1741_v23, %v1738_v61  ;;  %5371 = vmatprep.subr.bf16.mxu0 %v5704_v0  ;;  %5377 = vmatprep.subr.bf16.mxu1 %v5704_v0 }
 0x74c   :  { %4916 = vmatprep.mubr.msk.f32.mxu0 %vm5705_vm0, %v5706_v4  ;;  %4927 = vmatprep.mubr.msk.f32.mxu1 %vm5705_vm0, %v5706_v4 }
 0x74d   :  { %v1747_v1 = vadd.f32 %v1746_v17, %v1743_v63 }
 0x74e   :  { %5373 = vmatpush3.bf16.msra.mxu0 %v5936_v56  ;;  %5379 = vmatpush3.bf16.msra.mxu1 %v5977_v11 }
 0x74f   :  { %v6235_v62 = vrot.slane %v1747_v1, 2  ;;  %5380 = vmatprep.subr.bf16.mxu0 %v5704_v0  ;;  %5386 = vmatprep.subr.bf16.mxu1 %v5704_v0 }
 0x751   :  { %4917 = vmatmul.mubr.msk.f32.vlgmr.msra.gmra.mrb[20].mxu0 %vm206_vm1, %v1751_v60  ;;  %4928 = vmatmul.mubr.msk.f32.vlgmr.msra.gmra.mrb[24].mxu1 %vm206_vm1, %v6235_v62 }
 0x752   :  { %5382 = vmatpush3.bf16.msra.mxu0 %v6008_v22  ;;  %5388 = vmatpush3.bf16.msra.mxu1 %v5998_v19 }
 0x753   :  { %5383 = vmatprep.subr.bf16.mxu0 %v5704_v0  ;;  %5389 = vmatprep.subr.bf16.mxu1 %v5704_v0 }
 0x754   :  { %4938 = vmatprep.mubr.msk.f32.mxu0 %vm5705_vm0, %v5706_v4  ;;  %4949 = vmatprep.mubr.msk.f32.mxu1 %vm5705_vm0, %v5706_v4 }
 0x756   :  { %5385 = vmatpush3.bf16.msra.mxu0 %v6028_v27  ;;  %5391 = vmatpush3.bf16.msra.mxu1 %v6018_v25 }
 0x757   :  { %5392 = vmatprep.subr.bf16.mxu0 %v5704_v0  ;;  %5398 = vmatprep.subr.bf16.mxu1 %v5704_v0 }
 0x759   :  { %4939 = vmatmul.mubr.msk.f32.vlgmr.msra.gmra.mrb[22].mxu0 %vm206_vm1, %v6235_v62  ;;  %4950 = vmatmul.mubr.msk.f32.vlgmr.msra.gmra.mrb[26].mxu1 %vm206_vm1, %v6235_v62 }
 0x75a   :  { %5394 = vmatpush3.bf16.msra.mxu0 %v5817_v9  ;;  %5400 = vmatpush3.bf16.msra.mxu1 %v5866_v29 }
 0x75b   :  { %5395 = vmatprep.subr.bf16.mxu0 %v5704_v0  ;;  %5401 = vmatprep.subr.bf16.mxu1 %v5704_v0 }
 0x75c   :  { %4960 = vmatprep.mubr.msk.f32.mxu0 %vm5705_vm0, %v5706_v4  ;;  %4971 = vmatprep.mubr.msk.f32.mxu1 %vm5705_vm0, %v5706_v4 }
 0x75e   :  { %5397 = vmatpush3.bf16.msra.mxu0 %v5838_v18  ;;  %5403 = vmatpush3.bf16.msra.mxu1 %v5889_v38 }
 0x75f   :  { %5404 = vmatprep.subr.bf16.mxu0 %v5704_v0  ;;  %5410 = vmatprep.subr.bf16.mxu1 %v5704_v0 }
 0x81c   :  { %v1820_v3 = vpop.f32.mrb[18].mxu0  ;;  %v1900_v5 = vpop.f32.mrb[22].mxu1 }
 0x81d   :  { %v1825_v7 = vrot.slane %v1820_v3, 2  ;;  %v4896_v8 = vpop.f32.mrb[19].mxu0  ;;  %v4907_v10 = vpop.f32.mrb[23].mxu1  ;;  %v1905_v35 = vrot.slane %v1900_v5, 2  ;;  %v2245_v3 = vrot.slane %v6218_v53, 6 }
 0x81f   :  { %v1827_v12 = vadd.f32 %v1825_v7, %v6054_v46 }
 0x821   :  { %v4395_v13 = vmul.f32 -1.442695, %v1827_v12 }
 0x823   :  { %5602 = vpow2.f32 %v4395_v13 }
 0x824   :  { %v1982_v14 = vpop.f32.mrb[20].mxu0  ;;  %v2066_v15 = vpop.f32.mrb[24].mxu1 }
 0x825   :  { %2071 = vrot.lane.b32.xlu0 %v2066_v15, %s5707_s3  ;;  %v4918_v16 = vpop.f32.mrb[21].mxu0  ;;  %v4929_v17 = vpop.f32.mrb[25].mxu1  ;;  %v1983_v31 = vadd.f32 %v6075_v6, %v1982_v14 }
 0x827   :  { %v1987_v33 = vrot.slane %v1983_v31, 2 }
 0x82c   :  { %v2147_v20 = vpop.f32.mrb[22].mxu0  ;;  %v2224_v21 = vpop.f32.mrb[26].mxu1 }
 0x82d   :  { %v5603_v24 = vpop.eup %5602  ;;  %v2225_v26 = vadd.f32 %v6065_v57, %v2224_v21  ;;  %v4940_v28 = vpop.f32.mrb[23].mxu0  ;;  %v2151_v15 = vadd.f32 %v2147_v20, %v6067_v58 }
 0x82e   :  { %v4951_v30 = vpop.f32.mrb[27].mxu1  ;;  %v1831_v43 = vadd.f32 1.0, %v5603_v24 }
 0x82f   :  { %2229 = vrot.lane.b32.xlu0 %v2225_v26, %s5707_s3  ;;  %v4402_v16 = vmul.f32 -1.442695, %v2151_v15 }
 0x830   :  { %5604 = vrcp.f32 %v1831_v43 }
 0x83a   :  { %v5605_v34 = vpop.eup %5604 }
 0x83b   :  { %v1989_v32 = vmul.f32 %v5605_v34, %v1987_v33 }
 0x83d   :  { %1991 = vrot.lane.b32.xlu1 %v1989_v32, %s5709_s27 }
 0x841   :  { %1906 = vrot.lane.b32.xlu1 %v1905_v35, %s5708_s25 }
 0x897   :  { %v2072_v36 = vpop.permute.xlu0 %2071 }
 0x898   :  { %v2074_v37 = vadd.f32 %v2072_v36, %v6060_v54 }
 0x89a   :  { %v4400_v39 = vmul.f32 -1.442695, %v2074_v37 }
 0x89c   :  { %5606 = vpow2.f32 %v4400_v39 }
 0x8a1   :  { %v2230_v48 = vpop.permute.xlu0 %2229 }
 0x8a6   :  { %v5607_v40 = vpop.eup %5606 }
 0x8a7   :  { %v2078_v41 = vadd.f32 1.0, %v5607_v40 }
 0x8a9   :  { %5608 = vrcp.f32 %v2078_v41 }
 0x8af   :  { %v1992_v42 = vpop.permute.xlu1 %1991 }
 0x8b0   :  { %v1994_v44 = vadd.f32 %v1992_v42, %v6054_v46 }
 0x8b2   :  { %5610 = vtanh.f32 %v1994_v44 }
 0x8b3   :  { %v5609_v45 = vpop.eup %5608  ;;  %v1907_v52 = vpop.permute.xlu1 %1906 }
 0x8b4   :  { %v2232_v49 = vmul.f32 %v5609_v45, %v2230_v48  ;;  %v1909_v55 = vadd.f32 %v1907_v52, %v6054_v46 }
 0x8b6   :  { %2234 = vrot.lane.b32.xlu0 %v2232_v49, %s5709_s27  ;;  %v4397_v59 = vmul.f32 -1.442695, %v1909_v55 }
 0x8b8   :  { %5612 = vpow2.f32 %v4397_v59 }
 0x8bc   :  { %v5611_v51 = vpop.eup %5610 }
 0x8bd   :  { %2241 = vrot.lane.b32.xlu1 %v5611_v51, %s5707_s3 }
 0x8c2   :  { %v5613_v60 = vpop.eup %5612 }
 0x8c3   :  { %v1913_v61 = vadd.f32 1.0, %v5613_v60 }
 0x8c5   :  { %5614 = vrcp.f32 %v1913_v61 }
 0x8cf   :  { %v5615_v1 = vpop.eup %5614 }
 0x8d0   :  { %v2239_v5 = vsub.f32 1.0, %v5615_v1  ;;  %v2247_v8 = vmul.f32 %v5615_v1, %v2245_v3 }
 0x928   :  { %v2235_v23 = vpop.permute.xlu0 %2234 }
 0x929   :  { %v2237_v63 = vadd.f32 %v2235_v23, %v6067_v58 }
 0x92b   :  { %5616 = vtanh.f32 %v2237_v63 }
 0x92c   :  { %5618 = vpow2.f32 %v4402_v16 }
 0x92f   :  { %v2242_v7 = vpop.permute.xlu1 %2241 }
 0x930   :  { %v2244_v10 = vmul.f32 %v2242_v7, %v2239_v5 }
 0x932   :  { %v6284_v12 = vadd.f32 %v2247_v8, %v2244_v10 }
 0x934   :  { %v2259_v13 = vrot.slane %v6284_v12, 6 }
 0x935   :  { %v5617_v14 = vpop.eup %5616 }
 0x936   :  { %2251 = vrot.lane.b32.xlu1 %v5617_v14, %s5707_s3  ;;  %2260 = vrot.lane.b32.xlu0 %v2259_v13, %s5707_s3  ;;  %v5619_v53 = vpop.eup %5618 }
 0x937   :  { %v2155_v17 = vadd.f32 1.0, %v5619_v53 }
 0x939   :  { %5620 = vrcp.f32 %v2155_v17 }
 0x943   :  { %v5621_v21 = vpop.eup %5620 }
 0x944   :  { %v2249_v28 = vsub.f32 1.0, %v5621_v21  ;;  %v2256_v58 = vmul.f32 %v5621_v21, %v6235_v62 }
 0x9a8   :  { %v2252_v24 = vpop.permute.xlu1 %2251  ;;  %v2261_v26 = vpop.permute.xlu0 %2260 }
 0x9a9   :  { %4961 = vmatmul.mubr.msk.f32.vlgmr.msra.gmra.mrb[24].mxu0 %vm206_vm1, %v2261_v26  ;;  %4972 = vmatmul.mubr.msk.f32.vlgmr.msra.gmra.mrb[28].mxu1 %vm206_vm1, %v2261_v26  ;;  %v2254_v30 = vmul.f32 %v2252_v24, %v2249_v28 }
 0x9aa   :  { %5406 = vmatpush3.bf16.msra.mxu0 %v5913_v47  ;;  %5412 = vmatpush3.bf16.msra.mxu1 %v5960_v2 }
 0x9ab   :  { %5407 = vmatprep.subr.bf16.mxu0 %v5704_v0  ;;  %5413 = vmatprep.subr.bf16.mxu1 %v5704_v0  ;;  %v6305_v20 = vadd.f32 %v2256_v58, %v2254_v30 }
 0x9ac   :  { %4982 = vmatprep.mubr.msk.f32.mxu0 %vm5705_vm0, %v5706_v4  ;;  %4993 = vmatprep.mubr.msk.f32.mxu1 %vm5705_vm0, %v5706_v4 }
 0x9ae   :  { %5409 = vmatpush3.bf16.msra.mxu0 %v5936_v56  ;;  %5415 = vmatpush3.bf16.msra.mxu1 %v5977_v11 }
 0x9af   :  { %5416 = vmatprep.subr.bf16.mxu0 %v5704_v0  ;;  %5422 = vmatprep.subr.bf16.mxu1 %v5704_v0 }
 0x9b1   :  { %4983 = vmatmul.mubr.msk.f32.vlgmr.msra.gmra.mrb[26].mxu0 %vm206_vm1, %v2261_v26  ;;  %4994 = vmatmul.mubr.msk.f32.vlgmr.msra.gmra.mrb[30].mxu1 %vm206_vm1, %v6305_v20 }
 0x9b2   :  { %5418 = vmatpush3.bf16.msra.mxu0 %v6008_v22  ;;  %5424 = vmatpush3.bf16.msra.mxu1 %v5998_v19 }
 0x9b3   :  { %5419 = vmatprep.subr.bf16.mxu0 %v5704_v0  ;;  %5425 = vmatprep.subr.bf16.mxu1 %v5704_v0 }
 0x9b4   :  { %5004 = vmatprep.mubr.msk.f32.mxu0 %vm5705_vm0, %v5706_v4  ;;  %5015 = vmatprep.mubr.msk.f32.mxu1 %vm5705_vm0, %v5706_v4 }
 0x9b6   :  { %5421 = vmatpush3.bf16.msra.mxu0 %v6028_v27  ;;  %5427 = vmatpush3.bf16.msra.mxu1 %v6018_v25 }
 0x9b7   :  { %5428 = vmatprep.subr.bf16.mxu0 %v5704_v0  ;;  %5434 = vmatprep.subr.bf16.mxu1 %v5704_v0 }
 0x9b9   :  { %5005 = vmatmul.mubr.msk.f32.vlgmr.msra.gmra.mrb[28].mxu0 %vm206_vm1, %v6305_v20  ;;  %5016 = vmatmul.mubr.msk.f32.vlgmr.msra.gmra.mrb[32].mxu1 %vm206_vm1, %v6305_v20 }
 0x9ba   :  { %5430 = vmatpush3.bf16.msra.mxu0 %v5817_v9  ;;  %5436 = vmatpush3.bf16.msra.mxu1 %v5866_v29 }
 0x9bb   :  { %5431 = vmatprep.subr.bf16.mxu0 %v5704_v0  ;;  %5437 = vmatprep.subr.bf16.mxu1 %v5704_v0 }
 0x9bc   :  { %5026 = vmatprep.mubr.msk.f32.mxu0 %vm5705_vm0, %v5706_v4  ;;  %5037 = vmatprep.mubr.msk.f32.mxu1 %vm5705_vm0, %v5706_v4 }
 0x9be   :  { %5433 = vmatpush3.bf16.msra.mxu0 %v5838_v18  ;;  %5439 = vmatpush3.bf16.msra.mxu1 %v5889_v38 }
 0x9bf   :  { %5440 = vmatprep.subr.bf16.mxu0 %v5704_v0  ;;  %5446 = vmatprep.subr.bf16.mxu1 %v5704_v0 }
 0xa7c   :  { %v2330_v62 = vpop.f32.mrb[24].mxu0  ;;  %v2407_v43 = vpop.f32.mrb[28].mxu1 }
 0xa7d   :  { %v2334_v31 = vadd.f32 %v2330_v62, %v6060_v54  ;;  %v4962_v33 = vpop.f32.mrb[25].mxu0  ;;  %v4973_v34 = vpop.f32.mrb[29].mxu1 }
 0xa7f   :  { %v4405_v32 = vmul.f32 -1.442695, %v2334_v31 }
 0xa81   :  { %5622 = vpow2.f32 %v4405_v32 }
 0xa84   :  { %v2488_v35 = vpop.f32.mrb[26].mxu0  ;;  %v2568_v36 = vpop.f32.mrb[30].mxu1 }
 0xa85   :  { %v2573_v37 = vrot.slane %v2568_v36, 2  ;;  %v4984_v39 = vpop.f32.mrb[27].mxu0  ;;  %v4995_v40 = vpop.f32.mrb[31].mxu1  ;;  %v2489_v61 = vadd.f32 %v6075_v6, %v2488_v35 }
 0xa87   :  { %2574 = vrot.lane.b32.xlu0 %v2573_v37, %s5707_s3 }
 0xa8b   :  { %v5623_v41 = vpop.eup %5622 }
 0xa8c   :  { %v2338_v42 = vadd.f32 1.0, %v5623_v41  ;;  %v2650_v44 = vpop.f32.mrb[28].mxu0  ;;  %v2730_v45 = vpop.f32.mrb[32].mxu1 }
 0xa8d   :  { %v2655_v48 = vrot.slane %v2650_v44, 2  ;;  %v2731_v49 = vadd.f32 %v6065_v57, %v2730_v45  ;;  %v5006_v51 = vpop.f32.mrb[29].mxu0  ;;  %v5017_v52 = vpop.f32.mrb[33].mxu1  ;;  %v2761_v57 = vrot.slane %v6305_v20, 2 }
 0xa8e   :  { %5624 = vrcp.f32 %v2338_v42 }
 0xa8f   :  { %v2657_v55 = vadd.f32 %v2655_v48, %v6056_v50  ;;  %v2735_v59 = vrot.slane %v2731_v49, 2 }
 0xa91   :  { %v4412_v60 = vmul.f32 -1.442695, %v2657_v55  ;;  %2736 = vrot.lane.b32.xlu0 %v2735_v59, %s5707_s3 }
 0xa93   :  { %5626 = vpow2.f32 %v4412_v60 }
 0xa98   :  { %v5625_v23 = vpop.eup %5624 }
 0xa99   :  { %v2492_v63 = vmul.f32 %v5625_v23, %v2489_v61 }
 0xa9b   :  { %2494 = vrot.lane.b32.xlu1 %v2492_v63, %s5709_s27 }
 0xa9d   :  { %v5627_v1 = vpop.eup %5626 }
 0xa9e   :  { %v2661_v3 = vadd.f32 1.0, %v5627_v1 }
 0xa9f   :  { %2412 = vrot.lane.b32.xlu1 %v2407_v43, %s5708_s25 }
 0xaa0   :  { %5628 = vrcp.f32 %v2661_v3 }
 0xaaa   :  { %v5629_v5 = vpop.eup %5628 }
 0xaab   :  { %v2763_v7 = vmul.f32 %v5629_v5, %v2761_v57  ;;  %v2755_v12 = vsub.f32 1.0, %v5629_v5 }
 0xaf9   :  { %v2575_v8 = vpop.permute.xlu0 %2574 }
 0xafa   :  { %v2577_v10 = vadd.f32 %v2575_v8, %v6054_v46 }
 0xafc   :  { %v4410_v14 = vmul.f32 -1.442695, %v2577_v10 }
 0xafe   :  { %5630 = vpow2.f32 %v4410_v14 }
 0xb03   :  { %v2737_v21 = vpop.permute.xlu0 %2736 }
 0xb08   :  { %v5631_v15 = vpop.eup %5630 }
 0xb09   :  { %v2581_v6 = vadd.f32 1.0, %v5631_v15 }
 0xb0b   :  { %5632 = vrcp.f32 %v2581_v6  ;;  %v6413_v6 = vld [vmem:[%s6583_s11] ss:$0 sm:$0xff] }
 0xb0d   :  { %v2495_v16 = vpop.permute.xlu1 %2494 }
 0xb0e   :  { %v2497_v53 = vadd.f32 %v2495_v16, %v6060_v54 }
 0xb10   :  { %5634 = vtanh.f32 %v2497_v53 }
 0xb11   :  { %v2413_v28 = vpop.permute.xlu1 %2412 }
 0xb12   :  { %v2415_v30 = vadd.f32 %v2413_v28, %v6060_v54 }
 0xb14   :  { %v4407_v58 = vmul.f32 -1.442695, %v2415_v30 }
 0xb15   :  { %v5633_v17 = vpop.eup %5632 }
 0xb16   :  { %v2739_v24 = vmul.f32 %v5633_v17, %v2737_v21  ;;  %5636 = vpow2.f32 %v4407_v58  ;;  %v6419_v21 = vld [vmem:[%s6584_s10] ss:$0 sm:$0xff] }
 0xb18   :  { %2741 = vrot.lane.b32.xlu0 %v2739_v24, %s5709_s27 }
 0xb1a   :  { %v5635_v26 = vpop.eup %5634 }
 0xb1b   :  { %2748 = vrot.lane.b32.xlu1 %v5635_v26, %s5707_s3 }
 0xb20   :  { %v5637_v20 = vpop.eup %5636 }
 0xb21   :  { %v2419_v62 = vadd.f32 1.0, %v5637_v20 }
 0xb23   :  { %5638 = vrcp.f32 %v2419_v62 }
 0xb2d   :  { %v5639_v43 = vpop.eup %5638 }
 0xb2e   :  { %v2746_v34 = vsub.f32 1.0, %v5639_v43  ;;  %v2753_v35 = vmul.f32 %v5639_v43, %v2259_v13 }
 0xb8a   :  { %v2742_v31 = vpop.permute.xlu0 %2741 }
 0xb8b   :  { %v2744_v33 = vadd.f32 %v2742_v31, %v6056_v50 }
 0xb8d   :  { %5640 = vtanh.f32 %v2744_v33  ;;  %v2749_v32 = vpop.permute.xlu1 %2748 }
 0xb8e   :  { %v2751_v36 = vmul.f32 %v2749_v32, %v2746_v34 }
 0xb90   :  { %v6357_v37 = vadd.f32 %v2753_v35, %v2751_v36 }
 0xb92   :  { %2766 = vrot.lane.b32.xlu0 %v6357_v37, %s5707_s3 }
 0xb97   :  { %v5641_v39 = vpop.eup %5640 }
 0xb98   :  { %2757 = vrot.lane.b32.xlu1 %v5641_v39, %s5707_s3 }
 0xc04   :  { %v2767_v40 = vpop.permute.xlu0 %2766 }
 0xc05   :  { %5027 = vmatmul.mubr.msk.f32.vlgmr.msra.gmra.mrb[30].mxu0 %vm206_vm1, %v2767_v40  ;;  %5038 = vmatmul.mubr.msk.f32.vlgmr.msra.gmra.mrb[34].mxu1 %vm206_vm1, %v2767_v40 }
 0xc06   :  { %5442 = vmatpush3.bf16.msra.mxu0 %v5913_v47  ;;  %5448 = vmatpush3.bf16.msra.mxu1 %v5960_v2 }
 0xc07   :  { %5443 = vmatprep.subr.bf16.mxu0 %v5704_v0  ;;  %5048 = vmatprep.mubr.msk.f32.mxu0 %vm5705_vm0, %v5706_v4 }
 0xc08   :  { %5449 = vmatprep.subr.bf16.mxu1 %v5704_v0  ;;  %5059 = vmatprep.mubr.msk.f32.mxu1 %vm5705_vm0, %v5706_v4 }
 0xc0a   :  { %5445 = vmatpush3.bf16.msra.mxu0 %v5936_v56  ;;  %v2758_v13 = vpop.permute.xlu1 %2757  ;;  %5451 = vmatpush3.bf16.msra.mxu1 %v5977_v11 }
 0xc0b   :  { %v2760_v41 = vmul.f32 %v2758_v13, %v2755_v12  ;;  %5452 = vmatprep.subr.bf16.mxu0 %v5704_v0  ;;  %5458 = vmatprep.subr.bf16.mxu1 %v5704_v0 }
 0xc0d   :  { %v6376_v42 = vadd.f32 %v2763_v7, %v2760_v41  ;;  %5049 = vmatmul.mubr.msk.f32.vlgmr.msra.gmra.mrb[32].mxu0 %vm206_vm1, %v2767_v40 }
 0xc0e   :  { %5454 = vmatpush3.bf16.msra.mxu0 %v6008_v22  ;;  %5070 = vmatprep.mubr.msk.f32.mxu0 %vm5705_vm0, %v5706_v4 }
 0xc0f   :  { %v3013_v44 = vrot.slane %v6376_v42, 6  ;;  %5455 = vmatprep.subr.bf16.mxu0 %v5704_v0  ;;  %v3276_v43 = vrot.slane %v6376_v42, 2 }
 0xc11   :  { %5060 = vmatmul.mubr.msk.f32.vlgmr.msra.gmra.mrb[36].mxu1 %vm206_vm1, %v3013_v44 }
 0xc12   :  { %5460 = vmatpush3.bf16.msra.mxu1 %v5998_v19  ;;  %5457 = vmatpush3.bf16.msra.mxu0 %v6028_v27 }
 0xc13   :  { %5461 = vmatprep.subr.bf16.mxu1 %v5704_v0  ;;  %5081 = vmatprep.mubr.msk.f32.mxu1 %vm5705_vm0, %v5706_v4 }
 0xc14   :  { %5464 = vmatprep.subr.bf16.mxu0 %v5704_v0 }
 0xc15   :  { %5071 = vmatmul.mubr.msk.f32.vlgmr.msra.gmra.mrb[34].mxu0 %vm206_vm1, %v3013_v44 }
 0xc16   :  { %5463 = vmatpush3.bf16.msra.mxu1 %v6018_v25  ;;  %5466 = vmatpush3.bf16.msra.mxu0 %v5817_v9 }
 0xc17   :  { %5470 = vmatprep.subr.bf16.mxu1 %v5704_v0  ;;  %5467 = vmatprep.subr.bf16.mxu0 %v5704_v0 }
 0xc18   :  { %5092 = vmatprep.mubr.msk.f32.mxu0 %vm5705_vm0, %v5706_v4 }
 0xc19   :  { %5082 = vmatmul.mubr.msk.f32.vlgmr.msra.gmra.mrb[38].mxu1 %vm206_vm1, %v3013_v44 }
 0xc1a   :  { %5472 = vmatpush3.bf16.msra.mxu1 %v5866_v29  ;;  %5469 = vmatpush3.bf16.msra.mxu0 %v5838_v18 }
 0xc1b   :  { %5473 = vmatprep.subr.bf16.mxu1 %v5704_v0  ;;  %5103 = vmatprep.mubr.msk.f32.mxu1 %vm5705_vm0, %v5706_v4 }
 0xc1c   :  { %5476 = vmatprep.subr.bf16.mxu0 %v5704_v0 }
 0xc1e   :  { %5475 = vmatpush3.bf16.msra.mxu1 %v5889_v38 }
 0xc1f   :  { %5482 = vmatprep.subr.bf16.mxu1 %v5704_v0 }
 0xcd8   :  { %v2836_v45 = vpop.f32.mrb[30].mxu0  ;;  %v2916_v48 = vpop.f32.mrb[34].mxu1 }
 0xcd9   :  { %v2841_v49 = vrot.slane %v2836_v45, 6  ;;  %v5028_v51 = vpop.f32.mrb[31].mxu0  ;;  %v5039_v52 = vpop.f32.mrb[35].mxu1  ;;  %v2921_v62 = vrot.slane %v2916_v48, 6 }
 0xcdb   :  { %v2843_v55 = vadd.f32 %v2841_v49, %v6060_v54 }
 0xcdd   :  { %v4415_v59 = vmul.f32 -1.442695, %v2843_v55 }
 0xcdf   :  { %5642 = vpow2.f32 %v4415_v59  ;;  %v3266_v59 = vrot.slane %v6357_v37, 6 }
 0xce0   :  { %v2998_v60 = vpop.f32.mrb[32].mxu0 }
 0xce1   :  { %v5050_v61 = vpop.f32.mrb[33].mxu0  ;;  %v2999_v24 = vadd.f32 %v6419_v21, %v2998_v60 }
 0xce3   :  { %v3003_v26 = vrot.slane %v2999_v24, 6 }
 0xce4   :  { %v3082_v23 = vpop.f32.mrb[36].mxu1 }
 0xce5   :  { %v3087_v63 = vrot.slane %v3082_v23, 4  ;;  %v5061_v1 = vpop.f32.mrb[37].mxu1 }
 0xce7   :  { %3088 = vrot.lane.b32.xlu0 %v3087_v63, %s5707_s3 }
 0xce8   :  { %v3164_v3 = vpop.f32.mrb[34].mxu0 }
 0xce9   :  { %v5643_v57 = vpop.eup %5642  ;;  %v3169_v5 = vrot.slane %v3164_v3, 4  ;;  %v5072_v7 = vpop.f32.mrb[35].mxu0 }
 0xcea   :  { %v2847_v8 = vadd.f32 1.0, %v5643_v57 }
 0xceb   :  { %v3171_v10 = vadd.f32 %v3169_v5, %v6056_v50 }
 0xcec   :  { %5644 = vrcp.f32 %v2847_v8  ;;  %v3244_v14 = vpop.f32.mrb[38].mxu1 }
 0xced   :  { %v4422_v15 = vmul.f32 -1.442695, %v3171_v10  ;;  %v3245_v16 = vadd.f32 %v6413_v6, %v3244_v14  ;;  %v5083_v53 = vpop.f32.mrb[39].mxu1 }
 0xcef   :  { %5646 = vpow2.f32 %v4422_v15  ;;  %v3249_v17 = vrot.slane %v3245_v16, 4 }
 0xcf1   :  { %3250 = vrot.lane.b32.xlu0 %v3249_v17, %s5707_s3 }
 0xcf6   :  { %v5645_v28 = vpop.eup %5644 }
 0xcf7   :  { %v3005_v30 = vmul.f32 %v5645_v28, %v3003_v26 }
 0xcf9   :  { %v5647_v58 = vpop.eup %5646  ;;  %3007 = vrot.lane.b32.xlu1 %v3005_v30, %s5709_s27 }
 0xcfa   :  { %v3175_v20 = vadd.f32 1.0, %v5647_v58 }
 0xcfc   :  { %5648 = vrcp.f32 %v3175_v20 }
 0xcfd   :  { %2922 = vrot.lane.b32.xlu1 %v2921_v62, %s5708_s25 }
 0xd06   :  { %v5649_v31 = vpop.eup %5648 }
 0xd07   :  { %v3278_v33 = vmul.f32 %v5649_v31, %v3276_v43  ;;  %v3270_v37 = vsub.f32 1.0, %v5649_v31 }
 0xd59   :  { %v3089_v34 = vpop.permute.xlu0 %3088 }
 0xd5a   :  { %v3091_v32 = vadd.f32 %v3089_v34, %v6054_v46 }
 0xd5c   :  { %v4420_v35 = vmul.f32 -1.442695, %v3091_v32 }
 0xd5e   :  { %5650 = vpow2.f32 %v4420_v35 }
 0xd63   :  { %v3251_v41 = vpop.permute.xlu0 %3250 }
 0xd68   :  { %v5651_v36 = vpop.eup %5650 }
 0xd69   :  { %v3095_v39 = vadd.f32 1.0, %v5651_v36 }
 0xd6b   :  { %5652 = vrcp.f32 %v3095_v39  ;;  %v3008_v40 = vpop.permute.xlu1 %3007 }
 0xd6c   :  { %v3010_v12 = vadd.f32 %v3008_v40, %v6060_v54 }
 0xd6e   :  { %5654 = vtanh.f32 %v3010_v12 }
 0xd6f   :  { %v2923_v42 = vpop.permute.xlu1 %2922 }
 0xd70   :  { %v2925_v48 = vadd.f32 %v2923_v42, %v6060_v54 }
 0xd72   :  { %v4417_v49 = vmul.f32 -1.442695, %v2925_v48 }
 0xd74   :  { %5656 = vpow2.f32 %v4417_v49 }
 0xd75   :  { %v5653_v13 = vpop.eup %5652 }
 0xd76   :  { %v3253_v44 = vmul.f32 %v5653_v13, %v3251_v41 }
 0xd78   :  { %v5655_v45 = vpop.eup %5654  ;;  %3255 = vrot.lane.b32.xlu0 %v3253_v44, %s5709_s27 }
 0xd79   :  { %3262 = vrot.lane.b32.xlu1 %v5655_v45, %s5707_s3 }
 0xd7e   :  { %v5657_v51 = vpop.eup %5656 }
 0xd7f   :  { %v2929_v52 = vadd.f32 1.0, %v5657_v51 }
 0xd81   :  { %5658 = vrcp.f32 %v2929_v52 }
 0xd8b   :  { %v5659_v55 = vpop.eup %5658 }
 0xd8c   :  { %v3260_v61 = vsub.f32 1.0, %v5659_v55  ;;  %v3268_v1 = vmul.f32 %v5659_v55, %v3266_v59 }
 0xdea   :  { %v3256_v60 = vpop.permute.xlu0 %3255 }
 0xdeb   :  { %v3258_v23 = vadd.f32 %v3256_v60, %v6056_v50  ;;  %v3263_v63 = vpop.permute.xlu1 %3262 }
 0xdec   :  { %v3265_v3 = vmul.f32 %v3263_v63, %v3260_v61 }
 0xded   :  { %5660 = vtanh.f32 %v3258_v23 }
 0xdee   :  { %v6433_v57 = vadd.f32 %v3268_v1, %v3265_v3 }
 0xdf0   :  { %v3281_v5 = vrot.slane %v6433_v57, 2 }
 0xdf2   :  { %3282 = vrot.lane.b32.xlu0 %v3281_v5, %s5707_s3 }
 0xdf7   :  { %v5661_v7 = vpop.eup %5660 }
 0xdf8   :  { %3272 = vrot.lane.b32.xlu1 %v5661_v7, %s5707_s3 }
 0xe64   :  { %v3283_v8 = vpop.permute.xlu0 %3282 }
 0xe65   :  { %5093 = vmatmul.mubr.msk.f32.vlgmr.msra.gmra.mrb[36].mxu0 %vm206_vm1, %v3283_v8  ;;  %5104 = vmatmul.mubr.msk.f32.vlgmr.msra.gmra.mrb[40].mxu1 %vm206_vm1, %v3283_v8 }
 0xe66   :  { %5478 = vmatpush3.bf16.msra.mxu0 %v5913_v47  ;;  %5484 = vmatpush3.bf16.msra.mxu1 %v5960_v2 }
 0xe67   :  { %5479 = vmatprep.subr.bf16.mxu0 %v5704_v0  ;;  %5114 = vmatprep.mubr.msk.f32.mxu0 %vm5705_vm0, %v5706_v4 }
 0xe68   :  { %5485 = vmatprep.subr.bf16.mxu1 %v5704_v0  ;;  %5125 = vmatprep.mubr.msk.f32.mxu1 %vm5705_vm0, %v5706_v4 }
 0xe6a   :  { %5481 = vmatpush3.bf16.msra.mxu0 %v5936_v56  ;;  %v3273_v10 = vpop.permute.xlu1 %3272  ;;  %5487 = vmatpush3.bf16.msra.mxu1 %v5977_v11 }
 0xe6b   :  { %v3275_v14 = vmul.f32 %v3273_v10, %v3270_v37  ;;  %5488 = vmatprep.subr.bf16.mxu0 %v5704_v0  ;;  %5494 = vmatprep.subr.bf16.mxu1 %v5704_v0 }
 0xe6d   :  { %v6452_v15 = vadd.f32 %v3278_v33, %v3275_v14  ;;  %5115 = vmatmul.mubr.msk.f32.vlgmr.msra.gmra.mrb[38].mxu0 %vm206_vm1, %v3283_v8 }
 0xe6e   :  { %5490 = vmatpush3.bf16.msra.mxu0 %v6008_v22  ;;  %5136 = vmatprep.mubr.msk.f32.mxu0 %vm5705_vm0, %v5706_v4 }
 0xe6f   :  { %v3529_v16 = vrot.slane %v6452_v15, 4  ;;  %5491 = vmatprep.subr.bf16.mxu0 %v5704_v0  ;;  %v3792_v51 = vrot.slane %v6452_v15, 2 }
 0xe71   :  { %5126 = vmatmul.mubr.msk.f32.vlgmr.msra.gmra.mrb[42].mxu1 %vm206_vm1, %v3529_v16 }
 0xe72   :  { %5496 = vmatpush3.bf16.msra.mxu1 %v5998_v19  ;;  %5493 = vmatpush3.bf16.msra.mxu0 %v6028_v27 }
 0xe73   :  { %5497 = vmatprep.subr.bf16.mxu1 %v5704_v0  ;;  %5147 = vmatprep.mubr.msk.f32.mxu1 %vm5705_vm0, %v5706_v4 }
 0xe74   :  { %5500 = vmatprep.subr.bf16.mxu0 %v5704_v0 }
 0xe75   :  { %5137 = vmatmul.mubr.msk.f32.vlgmr.msra.gmra.mrb[40].mxu0 %vm206_vm1, %v3529_v16 }
 0xe76   :  { %5499 = vmatpush3.bf16.msra.mxu1 %v6018_v25  ;;  %5502 = vmatpush3.bf16.msra.mxu0 %v5817_v9 }
 0xe77   :  { %5506 = vmatprep.subr.bf16.mxu1 %v5704_v0  ;;  %5503 = vmatprep.subr.bf16.mxu0 %v5704_v0 }
 0xe78   :  { %5158 = vmatprep.mubr.msk.f32.mxu0 %vm5705_vm0, %v5706_v4 }
 0xe79   :  { %5148 = vmatmul.mubr.msk.f32.vlgmr.msra.gmra.mrb[44].mxu1 %vm206_vm1, %v3529_v16 }
 0xe7a   :  { %5508 = vmatpush3.bf16.msra.mxu1 %v5866_v29  ;;  %5505 = vmatpush3.bf16.msra.mxu0 %v5838_v18 }
 0xe7b   :  { %5509 = vmatprep.subr.bf16.mxu1 %v5704_v0  ;;  %5169 = vmatprep.mubr.msk.f32.mxu1 %vm5705_vm0, %v5706_v4 }
 0xe7c   :  { %5512 = vmatprep.subr.bf16.mxu0 %v5704_v0 }
 0xe7e   :  { %5511 = vmatpush3.bf16.msra.mxu1 %v5889_v38 }
 0xe7f   :  { %5518 = vmatprep.subr.bf16.mxu1 %v5704_v0 }
 0xf38   :  { %v3352_v9 = vpop.f32.mrb[36].mxu0  ;;  %v3432_v53 = vpop.f32.mrb[40].mxu1 }
 0xf39   :  { %v3357_v17 = vrot.slane %v3352_v9, 4  ;;  %v5094_v24 = vpop.f32.mrb[37].mxu0  ;;  %v5105_v26 = vpop.f32.mrb[41].mxu1  ;;  %v3437_v49 = vrot.slane %v3432_v53, 4 }
 0xf3b   :  { %v3359_v29 = vadd.f32 %v3357_v17, %v6060_v54  ;;  %v3782_v17 = vrot.slane %v6433_v57, 6 }
 0xf3d   :  { %v4425_v28 = vmul.f32 -1.442695, %v3359_v29 }
 0xf3f   :  { %5662 = vpow2.f32 %v4425_v28 }
 0xf40   :  { %v3514_v18 = vpop.f32.mrb[38].mxu0 }
 0xf41   :  { %v5116_v30 = vpop.f32.mrb[39].mxu0  ;;  %v3515_v13 = vadd.f32 %v6419_v21, %v3514_v18 }
 0xf43   :  { %v3519_v41 = vrot.slane %v3515_v13, 4 }
 0xf44   :  { %v3598_v58 = vpop.f32.mrb[42].mxu1 }
 0xf45   :  { %v3603_v20 = vrot.slane %v3598_v58, 6  ;;  %v5127_v62 = vpop.f32.mrb[43].mxu1 }
 0xf47   :  { %3604 = vrot.lane.b32.xlu0 %v3603_v20, %s5707_s3 }
 0xf48   :  { %v3680_v43 = vpop.f32.mrb[40].mxu0 }
 0xf49   :  { %v5663_v38 = vpop.eup %5662  ;;  %v3685_v31 = vrot.slane %v3680_v43, 6  ;;  %v5138_v33 = vpop.f32.mrb[41].mxu0 }
 0xf4a   :  { %v3363_v34 = vadd.f32 1.0, %v5663_v38 }
 0xf4b   :  { %v3687_v32 = vadd.f32 %v3685_v31, %v6056_v50 }
 0xf4c   :  { %5664 = vrcp.f32 %v3363_v34  ;;  %v3760_v35 = vpop.f32.mrb[44].mxu1 }
 0xf4d   :  { %v4432_v36 = vmul.f32 -1.442695, %v3687_v32  ;;  %v3761_v39 = vadd.f32 %v6413_v6, %v3760_v35  ;;  %v5149_v40 = vpop.f32.mrb[45].mxu1 }
 0xf4f   :  { %5666 = vpow2.f32 %v4432_v36  ;;  %v3765_v12 = vrot.slane %v3761_v39, 6 }
 0xf51   :  { %3766 = vrot.lane.b32.xlu0 %v3765_v12, %s5707_s3 }
 0xf56   :  { %v5665_v44 = vpop.eup %5664 }
 0xf57   :  { %v3521_v45 = vmul.f32 %v5665_v44, %v3519_v41 }
 0xf59   :  { %v5667_v42 = vpop.eup %5666  ;;  %3523 = vrot.lane.b32.xlu1 %v3521_v45, %s5709_s27 }
 0xf5a   :  { %v3691_v48 = vadd.f32 1.0, %v5667_v42 }
 0xf5c   :  { %5668 = vrcp.f32 %v3691_v48 }
 0xf5d   :  { %3438 = vrot.lane.b32.xlu1 %v3437_v49, %s5708_s25 }
 0xf66   :  { %v5669_v52 = vpop.eup %5668 }
 0xf67   :  { %v3794_v55 = vmul.f32 %v5669_v52, %v3792_v51  ;;  %v3786_v57 = vsub.f32 1.0, %v5669_v52 }
 0xfb9   :  { %v3605_v59 = vpop.permute.xlu0 %3604 }
 0xfba   :  { %v3607_v60 = vadd.f32 %v3605_v59, %v6054_v46 }
 0xfbc   :  { %v4430_v61 = vmul.f32 -1.442695, %v3607_v60 }
 0xfbe   :  { %5670 = vpow2.f32 %v4430_v61 }
 0xfc3   :  { %v3767_v7 = vpop.permute.xlu0 %3766 }
 0xfc8   :  { %v5671_v23 = vpop.eup %5670 }
 0xfc9   :  { %v3611_v63 = vadd.f32 1.0, %v5671_v23 }
 0xfcb   :  { %5672 = vrcp.f32 %v3611_v63  ;;  %v3524_v1 = vpop.permute.xlu1 %3523 }
 0xfcc   :  { %v3526_v3 = vadd.f32 %v3524_v1, %v6060_v54  ;;  %v4444_v1 = vld [vmem:[%s6585_s12] ss:$0 sm:$0xff] }
 0xfce   :  { %5674 = vtanh.f32 %v3526_v3 }
 0xfcf   :  { %v3439_v10 = vpop.permute.xlu1 %3438 }
 0xfd0   :  { %v3441_v14 = vadd.f32 %v3439_v10, %v6060_v54 }
 0xfd2   :  { %v4427_v15 = vmul.f32 -1.442695, %v3441_v14 }
 0xfd4   :  { %5676 = vpow2.f32 %v4427_v15 }
 0xfd5   :  { %v5673_v5 = vpop.eup %5672 }
 0xfd6   :  { %v3769_v8 = vmul.f32 %v5673_v5, %v3767_v7 }
 0xfd8   :  { %v5675_v37 = vpop.eup %5674  ;;  %3771 = vrot.lane.b32.xlu0 %v3769_v8, %s5709_s27 }
 0xfd9   :  { %3778 = vrot.lane.b32.xlu1 %v5675_v37, %s5707_s3 }
 0xfde   :  { %v5677_v16 = vpop.eup %5676 }
 0xfdf   :  { %v3445_v9 = vadd.f32 1.0, %v5677_v16 }
 0xfe1   :  { %5678 = vrcp.f32 %v3445_v9 }
 0xfeb   :  { %v5679_v53 = vpop.eup %5678 }
 0xfec   :  { %v3776_v26 = vsub.f32 1.0, %v5679_v53  ;;  %v3784_v18 = vmul.f32 %v5679_v53, %v3782_v17 }
0x104a   :  { %v3772_v24 = vpop.permute.xlu0 %3771 }
0x104b   :  { %v3774_v29 = vadd.f32 %v3772_v24, %v6056_v50  ;;  %v3779_v28 = vpop.permute.xlu1 %3778 }
0x104c   :  { %v3781_v30 = vmul.f32 %v3779_v28, %v3776_v26 }
0x104d   :  { %5680 = vtanh.f32 %v3774_v29 }
0x104e   :  { %v6499_v58 = vadd.f32 %v3784_v18, %v3781_v30 }
0x1050   :  { %v3797_v20 = vrot.slane %v6499_v58, 4  ;;  %v4293_v16 = vrot.slane %v6499_v58, 6 }
0x1052   :  { %3798 = vrot.lane.b32.xlu0 %v3797_v20, %s5707_s3 }
0x1057   :  { %v5681_v62 = vpop.eup %5680 }
0x1058   :  { %3788 = vrot.lane.b32.xlu1 %v5681_v62, %s5707_s3 }
0x10c4   :  { %v3799_v43 = vpop.permute.xlu0 %3798 }
0x10c5   :  { %5159 = vmatmul.mubr.msk.f32.vlgmr.msra.gmra.mrb[42].mxu0 %vm206_vm1, %v3799_v43  ;;  %5170 = vmatmul.mubr.msk.f32.vlgmr.msra.gmra.mrb[46].mxu1 %vm206_vm1, %v3799_v43 }
0x10c6   :  { %5514 = vmatpush3.bf16.msra.mxu0 %v5913_v47  ;;  %5520 = vmatpush3.bf16.msra.mxu1 %v5960_v2 }
0x10c7   :  { %5515 = vmatprep.subr.bf16.mxu0 %v5704_v0  ;;  %5180 = vmatprep.mubr.msk.f32.mxu0 %vm5705_vm0, %v5706_v4 }
0x10c8   :  { %5521 = vmatprep.subr.bf16.mxu1 %v5704_v0  ;;  %5191 = vmatprep.mubr.msk.f32.mxu1 %vm5705_vm0, %v5706_v4 }
0x10ca   :  { %5517 = vmatpush3.bf16.msra.mxu0 %v5936_v56  ;;  %v3789_v38 = vpop.permute.xlu1 %3788  ;;  %5523 = vmatpush3.bf16.msra.mxu1 %v5977_v11 }
0x10cb   :  { %v3791_v31 = vmul.f32 %v3789_v38, %v3786_v57  ;;  %5524 = vmatprep.subr.bf16.mxu0 %v5704_v0  ;;  %5530 = vmatprep.subr.bf16.mxu1 %v5704_v0 }
0x10cd   :  { %v3795_v47 = vadd.f32 %v3794_v55, %v3791_v31  ;;  %5181 = vmatmul.mubr.msk.f32.vlgmr.msra.gmra.mrb[44].mxu0 %vm206_vm1, %v3799_v43 }
0x10ce   :  { %5526 = vmatpush3.bf16.msra.mxu0 %v6008_v22  ;;  %5202 = vmatprep.mubr.msk.f32.mxu0 %vm5705_vm0, %v5706_v4 }
0x10cf   :  { %v6522_v2 = vrot.slane %v3795_v47, 2  ;;  %5527 = vmatprep.subr.bf16.mxu0 %v5704_v0 }
0x10d1   :  { %5192 = vmatmul.mubr.msk.f32.vlgmr.msra.gmra.mrb[48].mxu1 %vm206_vm1, %v6522_v2 }
0x10d2   :  { %5532 = vmatpush3.bf16.msra.mxu1 %v5998_v19  ;;  %5529 = vmatpush3.bf16.msra.mxu0 %v6028_v27 }
0x10d3   :  { %5533 = vmatprep.subr.bf16.mxu1 %v5704_v0  ;;  %5213 = vmatprep.mubr.msk.f32.mxu1 %vm5705_vm0, %v5706_v4 }
0x10d5   :  { %5203 = vmatmul.mubr.msk.f32.vlgmr.msra.gmra.mrb[46].mxu0 %vm206_vm1, %v6522_v2 }
0x10d6   :  { %5535 = vmatpush3.bf16.msra.mxu1 %v6018_v25 }
0x10d9   :  { %5214 = vmatmul.mubr.msk.f32.vlgmr.msra.gmra.mrb[50].mxu1 %vm206_vm1, %v6522_v2 }
0x1198   :  { %v3868_v56 = vpop.f32.mrb[42].mxu0  ;;  %v3948_v11 = vpop.f32.mrb[46].mxu1 }
0x1199   :  { %v3873_v22 = vrot.slane %v3868_v56, 2  ;;  %v5160_v33 = vpop.f32.mrb[43].mxu0  ;;  %v5171_v19 = vpop.f32.mrb[47].mxu1  ;;  %v3953_v44 = vrot.slane %v3948_v11, 2  ;;  %v4445_v11 = vld [vmem:[%s6586_s13] ss:$0 sm:$0xff] }
0x119a   :  { %v21_v19 = vstv %s6587_s14 }
0x119b   :  { %v3875_v27 = vadd.f32 %v3873_v22, %v6060_v54  ;;  %22 = vst [vmem:[#allocation2] sm:$0x1] %v21_v19 }
0x119d   :  { %v4435_v34 = vmul.f32 -1.442695, %v3875_v27  ;;  %v23_v27 = vstv %s6588_s15 }
0x119e   :  { %24 = vst [vmem:[#allocation3] sm:$0x1] %v23_v27 }
0x119f   :  { %5682 = vpow2.f32 %v4435_v34 }
0x11a0   :  { %v4030_v0 = vpop.f32.mrb[44].mxu0 }
0x11a1   :  { %v5182_v32 = vpop.f32.mrb[45].mxu0  ;;  %v4031_v45 = vadd.f32 %v6419_v21, %v4030_v0 }
0x11a2   :  { %v4446_v34 = vld [vmem:[#allocation2] ss:$0 sm:$0xff] }
0x11a3   :  { %v4035_v42 = vrot.slane %v4031_v45, 2 }
0x11a4   :  { %v4114_v4 = vpop.f32.mrb[48].mxu1 }
0x11a5   :  { %4119 = vrot.lane.b32.xlu0 %v4114_v4, %s5707_s3  ;;  %v5193_v35 = vpop.f32.mrb[49].mxu1 }
0x11a8   :  { %v4195_v36 = vpop.f32.mrb[46].mxu0 }
0x11a9   :  { %v5683_v25 = vpop.eup %5682  ;;  %v5204_v39 = vpop.f32.mrb[47].mxu0  ;;  %v4199_v18 = vadd.f32 %v4195_v36, %v6056_v50 }
0x11aa   :  { %v3879_v40 = vadd.f32 1.0, %v5683_v25  ;;  %v4447_v39 = vld [vmem:[#allocation3] ss:$0 sm:$0xff] }
0x11ab   :  { %v4442_v30 = vmul.f32 -1.442695, %v4199_v18 }
0x11ac   :  { %5684 = vrcp.f32 %v3879_v40  ;;  %v4272_v12 = vpop.f32.mrb[50].mxu1 }
0x11ad   :  { %v4273_v13 = vadd.f32 %v6413_v6, %v4272_v12  ;;  %v5215_v41 = vpop.f32.mrb[51].mxu1 }
0x11af   :  { %4277 = vrot.lane.b32.xlu1 %v4273_v13, %s5707_s3 }
0x11b3   :  { %3954 = vrot.lane.b32.xlu1 %v3953_v44, %s5708_s25 }
0x11b6   :  { %v5685_v48 = vpop.eup %5684 }
0x11b7   :  { %v4037_v49 = vmul.f32 %v5685_v48, %v4035_v42 }
0x11b9   :  { %4039 = vrot.lane.b32.xlu0 %v4037_v49, %s5709_s27 }
0x1217   :  { %v4120_v51 = vpop.permute.xlu0 %4119 }
0x1218   :  { %v4122_v52 = vadd.f32 %v4120_v51, %v6054_v46 }
0x121a   :  { %v4440_v55 = vmul.f32 -1.442695, %v4122_v52 }
0x121c   :  { %5686 = vpow2.f32 %v4440_v55 }
0x1221   :  { %v4278_v23 = vpop.permute.xlu1 %4277 }
0x1225   :  { %v3955_v46 = vpop.permute.xlu1 %3954 }
0x1226   :  { %v5687_v59 = vpop.eup %5686  ;;  %v3957_v5 = vadd.f32 %v3955_v46, %v6060_v54 }
0x1227   :  { %v4126_v6 = vadd.f32 1.0, %v5687_v59 }
0x1228   :  { %v4437_v7 = vmul.f32 -1.442695, %v3957_v5 }
0x1229   :  { %5688 = vrcp.f32 %v4126_v6 }
0x122b   :  { %v4040_v60 = vpop.permute.xlu0 %4039 }
0x122c   :  { %v4042_v61 = vadd.f32 %v4040_v60, %v6060_v54 }
0x122e   :  { %5690 = vtanh.f32 %v4042_v61 }
0x122f   :  { %5692 = vpow2.f32 %v4437_v7 }
0x1233   :  { %v5689_v21 = vpop.eup %5688 }
0x1234   :  { %v4280_v63 = vmul.f32 %v5689_v21, %v4278_v23 }
0x1236   :  { %4282 = vrot.lane.b32.xlu0 %v4280_v63, %s5709_s27 }
0x1238   :  { %v5691_v3 = vpop.eup %5690 }
0x1239   :  { %4289 = vrot.lane.b32.xlu1 %v5691_v3, %s5707_s3  ;;  %v5693_v8 = vpop.eup %5692 }
0x123a   :  { %4312 = vrot.lane.b32.xlu0 %v4444_v1, %s5708_s25  ;;  %v3961_v37 = vadd.f32 1.0, %v5693_v8 }
0x123c   :  { %5694 = vrcp.f32 %v3961_v37 }
0x1246   :  { %v5695_v10 = vpop.eup %5694 }
0x1247   :  { %v4287_v9 = vsub.f32 1.0, %v5695_v10  ;;  %v4295_v24 = vmul.f32 %v5695_v10, %v4293_v16 }
0x12a8   :  { %v4283_v14 = vpop.permute.xlu0 %4282 }
0x12a9   :  { %v4285_v15 = vadd.f32 %v4283_v14, %v6056_v50 }
0x12ab   :  { %5696 = vtanh.f32 %v4285_v15  ;;  %v4290_v53 = vpop.permute.xlu1 %4289 }
0x12ac   :  { %v4292_v17 = vmul.f32 %v4290_v53, %v4287_v9  ;;  %v4313_v26 = vpop.permute.xlu0 %4312  ;;  %5698 = vpow2.f32 %v4442_v30 }
0x12ae   :  { %v4296_v29 = vadd.f32 %v4295_v24, %v4292_v17 }
0x12b0   :  { %v4315_v28 = vmul.f32 %v4313_v26, %v4296_v29 }
0x12b2   :  { %4317 = vrot.lane.b32.xlu0 %v4315_v28, %s5707_s3 }
0x12b5   :  { %v5697_v54 = vpop.eup %5696 }
0x12b6   :  { %4299 = vrot.lane.b32.xlu1 %v5697_v54, %s5707_s3  ;;  %v5699_v20 = vpop.eup %5698 }
0x12b7   :  { %v4203_v62 = vadd.f32 1.0, %v5699_v20 }
0x12b9   :  { %5700 = vrcp.f32 %v4203_v62 }
0x12c3   :  { %v5701_v58 = vpop.eup %5700 }
0x12c4   :  { %v4297_v38 = vsub.f32 1.0, %v5701_v58  ;;  %v4304_v56 = vmul.f32 %v5701_v58, %v6522_v2  ;;  %v4340_v2 = vld [vmem:[%s6589_s1] sm:$0x3] }
0x12c5   :  { %v4348_v0 = vmul.f32 %v4446_v34, %v4340_v2 }
0x12c7   :  { %v4351_v4 = vrot.slane %v4348_v0, 2 }
0x1324   :  { %v4318_v43 = vpop.permute.xlu0 %4317 }
0x1325   :  { %v4321_v57 = vsel %vm4320_vm2, %v4318_v43, 0.0 }
0x1326   :  { %4322 = vadd.xlane.f32.xlu0 %v4321_v57 }
0x1328   :  { %v4300_v31 = vpop.permute.xlu1 %4299 }
0x1329   :  { %v4302_v47 = vmul.f32 %v4300_v31, %v4297_v38 }
0x132b   :  { %v4305_v50 = vadd.f32 %v4304_v56, %v4302_v47 }
0x132d   :  { %v4331_v22 = vmul.f32 %v4445_v11, %v4305_v50 }
0x132f   :  { %v4333_v33 = vsel %vm4332_vm3, %v4331_v22, 0.0 }
0x1330   :  { %4334 = vadd.xlane.f32.xlu1 %v4333_v33 }
0x13b3   :  { %v4323_v36 = vpop.xlane.xlu0 %4322 }
0x13bd   :  { %v4335_v32 = vpop.xlane.xlu1 %4334 }
0x13be   :  { %v4337_v35 = vrot.slane %v4335_v32, 2 }
0x13c0   :  { %v4339_v25 = vadd.f32 %v4337_v35, %v4323_v36 }
0x13c2   :  { %v4353_v40 = vadd.f32 %v4351_v4, %v4339_v25 }
0x13c4   :  { %v4361_v12 = vadd.f32 %v4447_v39, %v4353_v40 }
0x13c6   :  { %4363 = vst.msk [vmem:[%s6590_s16 - $0x6] sm:$0xc0] %vm4362_vm4, %v4361_v12 }

</bundles_post_ra>
